<compile_context>
chip_gen: v5e
topology: v5e:2x2
jax: 0.10.0
libtpu: 0.0.40
codegen_flags: <defaults>
</compile_context>

<pallas_src>
import functools

import jax
import jax.numpy as jnp
from jax.experimental import pallas as pl
from jax.experimental.pallas import tpu as pltpu


LANE = 128      # vreg / MXU lane width
SUBLANE = 8     # f32 sublane count


def _round_up(x, m):
    return (x + m - 1) // m * m


# ----------------------------- Pallas kernel -------------------------------

def _conv_bn_relu_kernel(x_hbm, w_ref, scale_ref, shift_ref, o_ref,
                         xbuf, sem, *, TH, HT, W, Cin_p, Cout_p):
    """One (batch, row-tile) grid step of fused Conv3x3 + BN(eval) + ReLU.

    x_hbm:     (N, H+2, Wp, Cin_p)  zero-padded NHWC input, left in HBM (pl.ANY)
    w_ref:     (9, Cin_p, Cout_p)   conv taps, k = kh*3 + kw
    scale_ref: (1, Cout_p)          gamma / sqrt(var + eps)
    shift_ref: (1, Cout_p)          beta + scale * (conv_bias - running_mean)
    o_ref:     (TH, W, Cout_p)      output row tile (batch dim squeezed)
    xbuf:      (2, TH+2, Wp, Cin_p) VMEM scratch: manually double-buffered input slab
    sem:       (2,)                 DMA semaphores, one per slab slot
    """
    n = pl.program_id(0)
    t = pl.program_id(1)
    slot = t % 2

    def slab_copy(row_start, s):
        # One row slab = TH output rows + 1 halo row above/below.  The padded HBM
        # layout keeps every slab fully in bounds and of constant size.
        return pltpu.make_async_copy(
            x_hbm.at[n, pl.ds(row_start, TH + 2)], xbuf.at[s], sem.at[s])

    @pl.when(t == 0)
    def _():                          # prime the pipeline at the first row tile of each n
        slab_copy(0, 0).start()

    slab_copy(t * TH, slot).wait()    # slab for this tile (issued here or at step t-1)

    @pl.when(t + 1 < HT)
    def _():                          # prefetch the next row tile into the other slot
        slab_copy((t + 1) * TH, 1 - slot).start()

    # 3x3 conv as 9 accumulating MXU matmuls straight from the slab
    # (no im2col scratch, no per-step zero fill).
    acc = jnp.zeros((TH * W, Cout_p), jnp.float32)
    for kh in range(3):
        for kw in range(3):
            lhs = xbuf[slot, kh:kh + TH, kw:kw + W, :].reshape(TH * W, Cin_p)
            acc = acc + jnp.dot(lhs, w_ref[kh * 3 + kw],
                                preferred_element_type=jnp.float32)

    # Fused BatchNorm (eval mode, conv bias folded into shift) + ReLU in f32.
    y = acc * scale_ref[...] + shift_ref[...]
    y = jnp.maximum(y, 0.0)
    # Dropout(p=0) is the identity (also identity in eval mode for any p).
    # TODO(synk): training-mode dropout masking / batch-statistics BN not implemented
    #             (inference semantics only).
    o_ref[...] = y.reshape(TH, W, Cout_p).astype(o_ref.dtype)


# ------------------------------ JAX wrapper --------------------------------

def _vmem_budget():
    try:
        cap = int(pltpu.get_tpu_info().vmem_capacity_bytes)
    except Exception:
        cap = 64 * 1024 * 1024            # conservative (v7x-sized) fallback
    # ~48 MiB on v7x (64 MiB/TC), ~96 MiB on v5e/v6e (128 MiB/TC).
    return min(cap * 3 // 4, 100 * 1024 * 1024)


def _pick_tile_h(H, W, Wp, Cin_p, Cout_p, itemsize, budget):
    """Largest divisor of H whose per-step VMEM footprint fits the budget."""
    th_best = 1
    fixed = (2 * 9 * Cin_p * Cout_p * itemsize     # weights (auto double-buffered)
             + 4 * Cout_p * 4)                     # scale + shift
    for th in range(1, H + 1):
        if H % th:
            continue
        fp = (2 * (th + 2) * Wp * Cin_p * itemsize   # input slab, manual double buffer
              + 2 * th * W * Cout_p * 4              # output block, auto double buffer
              + 2 * th * W * Cout_p * 4)             # f32 accumulator + epilogue temps
        if fixed + fp <= budget:
            th_best = th
    return th_best


def conv2d_block(x_nchw, params, eps=1e-5, tile_h=None, use_bf16=False):
    """Forward pass of Conv2DBlock. Input/output are NCHW float32.

    use_bf16=True casts activations/weights to bf16 for the MXU (f32 accumulate and
    f32 BN/ReLU epilogue) -- recommended on v6e/v7x when a looser tolerance is OK.
    """
    N, Cin, H, W = x_nchw.shape
    wc = params["conv_w"]            # (Cout, Cin, 3, 3) torch OIHW
    bc = params["conv_b"]            # (Cout,)
    gamma, beta = params["bn_gamma"], params["bn_beta"]
    rmean, rvar = params["bn_mean"], params["bn_var"]
    Cout = wc.shape[0]

    compute_dtype = jnp.bfloat16 if use_bf16 else jnp.float32
    itemsize = jnp.dtype(compute_dtype).itemsize

    # Lane-dense channel padding (unmasked output stores, full-width MXU).
    Cin_p = _round_up(Cin, LANE)
    Cout_p = _round_up(Cout, LANE)
    # Conv halo + sublane alignment baked into the HBM layout once in the wrapper:
    # rows/cols 1..H / 1..W hold data, borders (and alignment columns) are zero.
    Wp = _round_up(W + 2, SUBLANE)

    vmem_limit = _vmem_budget()
    if tile_h is None:
        tile_h = _pick_tile_h(H, W, Wp, Cin_p, Cout_p, itemsize, vmem_limit // 2)
    TH = tile_h
    assert H % TH == 0, (H, TH)
    HT = H // TH

    # Layout plumbing: NCHW -> padded NHWC so channels are the lane dimension.
    x_nhwc = jnp.transpose(x_nchw, (0, 2, 3, 1)).astype(compute_dtype)
    xp = jnp.pad(x_nhwc, ((0, 0), (1, 1), (1, Wp - W - 1), (0, Cin_p - Cin)))

    # (Cout, Cin, 3, 3) -> (kh, kw, Cin, Cout) -> (9, Cin_p, Cout_p); k = kh*3 + kw.
    w = jnp.transpose(wc, (2, 3, 1, 0)).reshape(9, Cin, Cout)
    w = jnp.pad(w, ((0, 0), (0, Cin_p - Cin), (0, Cout_p - Cout))).astype(compute_dtype)

    inv_std = 1.0 / jnp.sqrt(rvar + eps)
    scale = jnp.pad(gamma * inv_std, (0, Cout_p - Cout))
    shift = jnp.pad(beta + gamma * inv_std * (bc - rmean), (0, Cout_p - Cout))
    scale = scale.reshape(1, Cout_p).astype(jnp.float32)
    shift = shift.reshape(1, Cout_p).astype(jnp.float32)

    kernel = functools.partial(_conv_bn_relu_kernel, TH=TH, HT=HT, W=W,
                               Cin_p=Cin_p, Cout_p=Cout_p)

    flops = 2 * N * H * W * 9 * Cin_p * Cout_p + 3 * N * H * W * Cout_p
    bytes_accessed = (xp.size * itemsize + w.size * itemsize
                      + 2 * Cout_p * 4 + N * H * W * Cout_p * 4)

    out_nhwc = pl.pallas_call(
        kernel,
        out_shape=jax.ShapeDtypeStruct((N, H, W, Cout_p), jnp.float32),
        grid=(N, HT),
        in_specs=[
            # Raw HBM ref: the kernel DMAs only a (TH+2, Wp, Cin_p) row slab per step
            # (no full-plane double-buffered block -> fits v7x's 64 MiB VMEM).
            pl.BlockSpec(memory_space=pl.ANY),
            # TODO(synk): single-buffer these three constant-index operands
            # (pipeline_mode=pl.Buffered(1)) once supported for top-level pallas_call specs.
            pl.BlockSpec((9, Cin_p, Cout_p), lambda n, t: (0, 0, 0)),
            pl.BlockSpec((1, Cout_p), lambda n, t: (0, 0)),
            pl.BlockSpec((1, Cout_p), lambda n, t: (0, 0)),
        ],
        out_specs=pl.BlockSpec((None, TH, W, Cout_p), lambda n, t: (n, t, 0, 0)),
        scratch_shapes=[
            pltpu.VMEM((2, TH + 2, Wp, Cin_p), compute_dtype),  # double-buffered slab
            pltpu.SemaphoreType.DMA((2,)),
        ],
        compiler_params=pltpu.CompilerParams(
            # Row tiles must run in order per batch element (manual prefetch chain);
            # batch elements shard across TensorCores (megacore) on v7x.
            dimension_semantics=("parallel", "arbitrary"),
            vmem_limit_bytes=int(vmem_limit),
        ),
        cost_estimate=pl.CostEstimate(flops=int(flops), transcendentals=0,
                                      bytes_accessed=int(bytes_accessed)),
    )(xp, w, scale, shift)

    out = out_nhwc[:, :, :, :Cout]            # drop channel padding
    return jnp.transpose(out, (0, 3, 1, 2))   # back to NCHW


# --------------------------- pure-JAX reference ----------------------------

def conv2d_block_ref(x, p, eps=1e-5):
    z = jax.lax.conv_general_dilated(
        x, p["conv_w"], window_strides=(1, 1), padding=((1, 1), (1, 1)),
        dimension_numbers=("NCHW", "OIHW", "NCHW"))
    z = z + p["conv_b"][None, :, None, None]
    inv = 1.0 / jnp.sqrt(p["bn_var"] + eps)
    z = (z - p["bn_mean"][None, :, None, None]) * (p["bn_gamma"] * inv)[None, :, None, None]
    z = z + p["bn_beta"][None, :, None, None]
    return jnp.maximum(z, 0.0)


# ---------------------------------- main -----------------------------------

if __name__ == "__main__":
    key = jax.random.PRNGKey(0)
    N, Cin, Cout, H, W = 2, 4, 8, 16, 16
    ks = jax.random.split(key, 7)

    x = jax.random.normal(ks[0], (N, Cin, H, W), jnp.float32)
    params = {
        "conv_w":   0.2 * jax.random.normal(ks[1], (Cout, Cin, 3, 3), jnp.float32),
        "conv_b":   0.1 * jax.random.normal(ks[2], (Cout,), jnp.float32),
        "bn_gamma": 1.0 + 0.1 * jax.random.normal(ks[3], (Cout,), jnp.float32),
        "bn_beta":  0.1 * jax.random.normal(ks[4], (Cout,), jnp.float32),
        "bn_mean":  0.1 * jax.random.normal(ks[5], (Cout,), jnp.float32),
        "bn_var":   1.0 + jax.nn.softplus(jax.random.normal(ks[6], (Cout,), jnp.float32)),
    }

    ref = jax.block_until_ready(conv2d_block_ref(x, params))

    # Run twice: default (VMEM-budget-picked, single row tile at this size) and an
    # explicit 4-row tiling that exercises the manual double-buffered DMA path (HT=4).
    for th in (None, 4):
        out = jax.block_until_ready(conv2d_block(x, params, tile_h=th))
        assert out.shape == (N, Cout, H, W), out.shape
        err = float(jnp.max(jnp.abs(out - ref)))
        assert jnp.allclose(out, ref, atol=1e-4, rtol=1e-4), (th, err)

    print("KERNEL_OK")
</pallas_src>

<mosaic_0001>
module attributes {stable_mosaic.version = 11 : i64} {
  func.func @_conv_bn_relu_kernel(%arg0: i32, %arg1: i32, %arg2: memref<2x18x24x128xf32, #tpu.memory_space<any>>, %arg3: memref<9x128x128xf32, #tpu.memory_space<vmem>>, %arg4: memref<1x128xf32, #tpu.memory_space<vmem>>, %arg5: memref<1x128xf32, #tpu.memory_space<vmem>>, %arg6: memref<1x16x16x128xf32, #tpu.memory_space<vmem>>, %arg7: memref<2x18x24x128xf32, #tpu.memory_space<vmem>>, %arg8: memref<2x!tpu.dma_semaphore, #tpu.memory_space<semaphore_mem>>) attributes {dimension_semantics = [#tpu.dimension_semantics<parallel>, #tpu.dimension_semantics<arbitrary>], iteration_bounds = array<i64: 2, 1>, scalar_prefetch = 0 : i64, scratch_operands = 2 : i64, tpu.core_type = #tpu.core_type<tc>, window_params = [{}, {pipeline_mode = #tpu.pipeline_mode<synchronous>, transform_indices = @transform_1, window_bounds = array<i64: 9, 128, 128>}, {pipeline_mode = #tpu.pipeline_mode<synchronous>, transform_indices = @transform_2, window_bounds = array<i64: 1, 128>}, {pipeline_mode = #tpu.pipeline_mode<synchronous>, transform_indices = @transform_3, window_bounds = array<i64: 1, 128>}, {transform_indices = @transform_4, window_bounds = array<i64: 1, 16, 16, 128>}]} {
    %c2_i32 = arith.constant 2 : i32
    %c0_i32 = arith.constant 0 : i32
    %0 = arith.cmpi eq, %c2_i32, %c0_i32 : i32
    %c1_i32 = arith.constant 1 : i32
    %1 = arith.select %0, %c1_i32, %c2_i32 : i32
    %2 = arith.remsi %arg1, %1 : i32
    %c0_i32_0 = arith.constant 0 : i32
    %3 = arith.cmpi ne, %2, %c0_i32_0 : i32
    %c0_i32_1 = arith.constant 0 : i32
    %4 = arith.cmpi slt, %2, %c0_i32_1 : i32
    %c0_i32_2 = arith.constant 0 : i32
    %5 = arith.cmpi slt, %1, %c0_i32_2 : i32
    %6 = arith.xori %4, %5 : i1
    %7 = arith.andi %6, %3 : i1
    %8 = arith.addi %2, %1 : i32
    %9 = arith.select %7, %8, %2 : i32
    %c0_i32_3 = arith.constant 0 : i32
    %10 = arith.cmpi eq, %arg1, %c0_i32_3 : i32
    %11 = arith.extui %10 : i1 to i32
    %c0_i32_4 = arith.constant 0 : i32
    %12 = arith.cmpi ne, %11, %c0_i32_4 : i32
    scf.if %12 {
      %c0_i32_76 = arith.constant 0 : i32
      %c0_i32_77 = arith.constant 0 : i32
      %c0_i32_78 = arith.constant 0 : i32
      %c0_i32_79 = arith.constant 0 : i32
      %c0_i32_80 = arith.constant 0 : i32
      %109 = tpu.memref_slice %arg2[%arg0, %c0_i32_78, %c0_i32_79, %c0_i32_80] : memref<2x18x24x128xf32, #tpu.memory_space<any>> -> memref<1x18x24x128xf32, #tpu.memory_space<any>>
      %110 = tpu.memref_squeeze %109 : memref<1x18x24x128xf32, #tpu.memory_space<any>> -> memref<18x24x128xf32, #tpu.memory_space<any>>
      %c0_i32_81 = arith.constant 0 : i32
      %c0_i32_82 = arith.constant 0 : i32
      %c0_i32_83 = arith.constant 0 : i32
      %111 = tpu.memref_slice %arg7[%c0_i32_76, %c0_i32_81, %c0_i32_82, %c0_i32_83] : memref<2x18x24x128xf32, #tpu.memory_space<vmem>> -> memref<1x18x24x128xf32, #tpu.memory_space<vmem>>
      %112 = tpu.memref_squeeze %111 : memref<1x18x24x128xf32, #tpu.memory_space<vmem>> -> memref<18x24x128xf32, #tpu.memory_space<vmem>>
      %113 = tpu.memref_slice %arg8[%c0_i32_77] : memref<2x!tpu.dma_semaphore, #tpu.memory_space<semaphore_mem>> -> memref<1x!tpu.dma_semaphore, #tpu.memory_space<semaphore_mem>>
      %114 = tpu.memref_squeeze %113 : memref<1x!tpu.dma_semaphore, #tpu.memory_space<semaphore_mem>> -> memref<!tpu.dma_semaphore, #tpu.memory_space<semaphore_mem>>
      tpu.enqueue_dma source(%110 : memref<18x24x128xf32, #tpu.memory_space<any>>) target(%112 : memref<18x24x128xf32, #tpu.memory_space<vmem>>) target_semaphore(%114 : memref<!tpu.dma_semaphore, #tpu.memory_space<semaphore_mem>>)
    } else {
    }
    %c16_i32 = arith.constant 16 : i32
    %13 = arith.muli %arg1, %c16_i32 : i32
    %c0_i32_5 = arith.constant 0 : i32
    %c0_i32_6 = arith.constant 0 : i32
    %14 = tpu.memref_slice %arg2[%arg0, %13, %c0_i32_5, %c0_i32_6] : memref<2x18x24x128xf32, #tpu.memory_space<any>> -> memref<1x18x24x128xf32, #tpu.memory_space<any>>
    %15 = tpu.memref_squeeze %14 : memref<1x18x24x128xf32, #tpu.memory_space<any>> -> memref<18x24x128xf32, #tpu.memory_space<any>>
    %c0_i32_7 = arith.constant 0 : i32
    %c0_i32_8 = arith.constant 0 : i32
    %c0_i32_9 = arith.constant 0 : i32
    %16 = tpu.memref_slice %arg7[%9, %c0_i32_7, %c0_i32_8, %c0_i32_9] : memref<2x18x24x128xf32, #tpu.memory_space<vmem>> -> memref<1x18x24x128xf32, #tpu.memory_space<vmem>>
    %17 = tpu.memref_squeeze %16 : memref<1x18x24x128xf32, #tpu.memory_space<vmem>> -> memref<18x24x128xf32, #tpu.memory_space<vmem>>
    %18 = tpu.memref_slice %arg8[%9] : memref<2x!tpu.dma_semaphore, #tpu.memory_space<semaphore_mem>> -> memref<1x!tpu.dma_semaphore, #tpu.memory_space<semaphore_mem>>
    %19 = tpu.memref_squeeze %18 : memref<1x!tpu.dma_semaphore, #tpu.memory_space<semaphore_mem>> -> memref<!tpu.dma_semaphore, #tpu.memory_space<semaphore_mem>>
    tpu.wait_dma2 semaphore(%19 : memref<!tpu.dma_semaphore, #tpu.memory_space<semaphore_mem>>) src(%15 : memref<18x24x128xf32, #tpu.memory_space<any>>) dst(%17 : memref<18x24x128xf32, #tpu.memory_space<vmem>>)
    %c1_i32_10 = arith.constant 1 : i32
    %20 = arith.addi %arg1, %c1_i32_10 : i32
    %c1_i32_11 = arith.constant 1 : i32
    %21 = arith.cmpi slt, %20, %c1_i32_11 : i32
    %22 = arith.extui %21 : i1 to i32
    %c0_i32_12 = arith.constant 0 : i32
    %23 = arith.cmpi ne, %22, %c0_i32_12 : i32
    scf.if %23 {
      %c1_i32_76 = arith.constant 1 : i32
      %109 = arith.addi %arg1, %c1_i32_76 : i32
      %c16_i32_77 = arith.constant 16 : i32
      %110 = arith.muli %109, %c16_i32_77 : i32
      %c1_i32_78 = arith.constant 1 : i32
      %111 = arith.subi %c1_i32_78, %9 : i32
      %c0_i32_79 = arith.constant 0 : i32
      %c0_i32_80 = arith.constant 0 : i32
      %112 = tpu.memref_slice %arg2[%arg0, %110, %c0_i32_79, %c0_i32_80] : memref<2x18x24x128xf32, #tpu.memory_space<any>> -> memref<1x18x24x128xf32, #tpu.memory_space<any>>
      %113 = tpu.memref_squeeze %112 : memref<1x18x24x128xf32, #tpu.memory_space<any>> -> memref<18x24x128xf32, #tpu.memory_space<any>>
      %c0_i32_81 = arith.constant 0 : i32
      %c0_i32_82 = arith.constant 0 : i32
      %c0_i32_83 = arith.constant 0 : i32
      %114 = tpu.memref_slice %arg7[%111, %c0_i32_81, %c0_i32_82, %c0_i32_83] : memref<2x18x24x128xf32, #tpu.memory_space<vmem>> -> memref<1x18x24x128xf32, #tpu.memory_space<vmem>>
      %115 = tpu.memref_squeeze %114 : memref<1x18x24x128xf32, #tpu.memory_space<vmem>> -> memref<18x24x128xf32, #tpu.memory_space<vmem>>
      %116 = tpu.memref_slice %arg8[%111] : memref<2x!tpu.dma_semaphore, #tpu.memory_space<semaphore_mem>> -> memref<1x!tpu.dma_semaphore, #tpu.memory_space<semaphore_mem>>
      %117 = tpu.memref_squeeze %116 : memref<1x!tpu.dma_semaphore, #tpu.memory_space<semaphore_mem>> -> memref<!tpu.dma_semaphore, #tpu.memory_space<semaphore_mem>>
      tpu.enqueue_dma source(%113 : memref<18x24x128xf32, #tpu.memory_space<any>>) target(%115 : memref<18x24x128xf32, #tpu.memory_space<vmem>>) target_semaphore(%117 : memref<!tpu.dma_semaphore, #tpu.memory_space<semaphore_mem>>)
    } else {
    }
    %cst = arith.constant 0.000000e+00 : f32
    %24 = vector.broadcast %cst : f32 to vector<256x128xf32>
    %25 = arith.index_cast %9 : i32 to index
    %c0 = arith.constant 0 : index
    %c0_13 = arith.constant 0 : index
    %c0_14 = arith.constant 0 : index
    %26 = vector.load %arg7[%25, %c0, %c0_13, %c0_14] : memref<2x18x24x128xf32, #tpu.memory_space<vmem>>, vector<1x16x16x128xf32>
    %27 = vector.shape_cast %26 : vector<1x16x16x128xf32> to vector<16x16x128xf32>
    %28 = vector.shape_cast %27 : vector<16x16x128xf32> to vector<256x128xf32>
    %c0_15 = arith.constant 0 : index
    %c0_16 = arith.constant 0 : index
    %c0_17 = arith.constant 0 : index
    %29 = vector.load %arg3[%c0_15, %c0_16, %c0_17] : memref<9x128x128xf32, #tpu.memory_space<vmem>>, vector<1x128x128xf32>
    %30 = vector.shape_cast %29 : vector<1x128x128xf32> to vector<128x128xf32>
    %cst_18 = arith.constant dense<0.000000e+00> : vector<256x128xf32>
    %31 = tpu.matmul %28, %30, %cst_18 {dimension_numbers = #tpu.dot_dimension_numbers<[1], [0], [0], [1], [0, 0, 1, 1], [], []>} : vector<256x128xf32>, vector<128x128xf32>, vector<256x128xf32> -> vector<256x128xf32>
    %32 = arith.addf %24, %31 : vector<256x128xf32>
    %33 = arith.index_cast %9 : i32 to index
    %c0_19 = arith.constant 0 : index
    %c1 = arith.constant 1 : index
    %c0_20 = arith.constant 0 : index
    %34 = vector.load %arg7[%33, %c0_19, %c1, %c0_20] : memref<2x18x24x128xf32, #tpu.memory_space<vmem>>, vector<1x16x16x128xf32>
    %35 = vector.shape_cast %34 : vector<1x16x16x128xf32> to vector<16x16x128xf32>
    %36 = vector.shape_cast %35 : vector<16x16x128xf32> to vector<256x128xf32>
    %c1_21 = arith.constant 1 : index
    %c0_22 = arith.constant 0 : index
    %c0_23 = arith.constant 0 : index
    %37 = vector.load %arg3[%c1_21, %c0_22, %c0_23] : memref<9x128x128xf32, #tpu.memory_space<vmem>>, vector<1x128x128xf32>
    %38 = vector.shape_cast %37 : vector<1x128x128xf32> to vector<128x128xf32>
    %cst_24 = arith.constant dense<0.000000e+00> : vector<256x128xf32>
    %39 = tpu.matmul %36, %38, %cst_24 {dimension_numbers = #tpu.dot_dimension_numbers<[1], [0], [0], [1], [0, 0, 1, 1], [], []>} : vector<256x128xf32>, vector<128x128xf32>, vector<256x128xf32> -> vector<256x128xf32>
    %40 = arith.addf %32, %39 : vector<256x128xf32>
    %41 = arith.index_cast %9 : i32 to index
    %c0_25 = arith.constant 0 : index
    %c2 = arith.constant 2 : index
    %c0_26 = arith.constant 0 : index
    %42 = vector.load %arg7[%41, %c0_25, %c2, %c0_26] : memref<2x18x24x128xf32, #tpu.memory_space<vmem>>, vector<1x16x16x128xf32>
    %43 = vector.shape_cast %42 : vector<1x16x16x128xf32> to vector<16x16x128xf32>
    %44 = vector.shape_cast %43 : vector<16x16x128xf32> to vector<256x128xf32>
    %c2_27 = arith.constant 2 : index
    %c0_28 = arith.constant 0 : index
    %c0_29 = arith.constant 0 : index
    %45 = vector.load %arg3[%c2_27, %c0_28, %c0_29] : memref<9x128x128xf32, #tpu.memory_space<vmem>>, vector<1x128x128xf32>
    %46 = vector.shape_cast %45 : vector<1x128x128xf32> to vector<128x128xf32>
    %cst_30 = arith.constant dense<0.000000e+00> : vector<256x128xf32>
    %47 = tpu.matmul %44, %46, %cst_30 {dimension_numbers = #tpu.dot_dimension_numbers<[1], [0], [0], [1], [0, 0, 1, 1], [], []>} : vector<256x128xf32>, vector<128x128xf32>, vector<256x128xf32> -> vector<256x128xf32>
    %48 = arith.addf %40, %47 : vector<256x128xf32>
    %49 = arith.index_cast %9 : i32 to index
    %c1_31 = arith.constant 1 : index
    %c0_32 = arith.constant 0 : index
    %c0_33 = arith.constant 0 : index
    %50 = vector.load %arg7[%49, %c1_31, %c0_32, %c0_33] : memref<2x18x24x128xf32, #tpu.memory_space<vmem>>, vector<1x16x16x128xf32>
    %51 = vector.shape_cast %50 : vector<1x16x16x128xf32> to vector<16x16x128xf32>
    %52 = vector.shape_cast %51 : vector<16x16x128xf32> to vector<256x128xf32>
    %c3 = arith.constant 3 : index
    %c0_34 = arith.constant 0 : index
    %c0_35 = arith.constant 0 : index
    %53 = vector.load %arg3[%c3, %c0_34, %c0_35] : memref<9x128x128xf32, #tpu.memory_space<vmem>>, vector<1x128x128xf32>
    %54 = vector.shape_cast %53 : vector<1x128x128xf32> to vector<128x128xf32>
    %cst_36 = arith.constant dense<0.000000e+00> : vector<256x128xf32>
    %55 = tpu.matmul %52, %54, %cst_36 {dimension_numbers = #tpu.dot_dimension_numbers<[1], [0], [0], [1], [0, 0, 1, 1], [], []>} : vector<256x128xf32>, vector<128x128xf32>, vector<256x128xf32> -> vector<256x128xf32>
    %56 = arith.addf %48, %55 : vector<256x128xf32>
    %57 = arith.index_cast %9 : i32 to index
    %c1_37 = arith.constant 1 : index
    %c1_38 = arith.constant 1 : index
    %c0_39 = arith.constant 0 : index
    %58 = vector.load %arg7[%57, %c1_37, %c1_38, %c0_39] : memref<2x18x24x128xf32, #tpu.memory_space<vmem>>, vector<1x16x16x128xf32>
    %59 = vector.shape_cast %58 : vector<1x16x16x128xf32> to vector<16x16x128xf32>
    %60 = vector.shape_cast %59 : vector<16x16x128xf32> to vector<256x128xf32>
    %c4 = arith.constant 4 : index
    %c0_40 = arith.constant 0 : index
    %c0_41 = arith.constant 0 : index
    %61 = vector.load %arg3[%c4, %c0_40, %c0_41] : memref<9x128x128xf32, #tpu.memory_space<vmem>>, vector<1x128x128xf32>
    %62 = vector.shape_cast %61 : vector<1x128x128xf32> to vector<128x128xf32>
    %cst_42 = arith.constant dense<0.000000e+00> : vector<256x128xf32>
    %63 = tpu.matmul %60, %62, %cst_42 {dimension_numbers = #tpu.dot_dimension_numbers<[1], [0], [0], [1], [0, 0, 1, 1], [], []>} : vector<256x128xf32>, vector<128x128xf32>, vector<256x128xf32> -> vector<256x128xf32>
    %64 = arith.addf %56, %63 : vector<256x128xf32>
    %65 = arith.index_cast %9 : i32 to index
    %c1_43 = arith.constant 1 : index
    %c2_44 = arith.constant 2 : index
    %c0_45 = arith.constant 0 : index
    %66 = vector.load %arg7[%65, %c1_43, %c2_44, %c0_45] : memref<2x18x24x128xf32, #tpu.memory_space<vmem>>, vector<1x16x16x128xf32>
    %67 = vector.shape_cast %66 : vector<1x16x16x128xf32> to vector<16x16x128xf32>
    %68 = vector.shape_cast %67 : vector<16x16x128xf32> to vector<256x128xf32>
    %c5 = arith.constant 5 : index
    %c0_46 = arith.constant 0 : index
    %c0_47 = arith.constant 0 : index
    %69 = vector.load %arg3[%c5, %c0_46, %c0_47] : memref<9x128x128xf32, #tpu.memory_space<vmem>>, vector<1x128x128xf32>
    %70 = vector.shape_cast %69 : vector<1x128x128xf32> to vector<128x128xf32>
    %cst_48 = arith.constant dense<0.000000e+00> : vector<256x128xf32>
    %71 = tpu.matmul %68, %70, %cst_48 {dimension_numbers = #tpu.dot_dimension_numbers<[1], [0], [0], [1], [0, 0, 1, 1], [], []>} : vector<256x128xf32>, vector<128x128xf32>, vector<256x128xf32> -> vector<256x128xf32>
    %72 = arith.addf %64, %71 : vector<256x128xf32>
    %73 = arith.index_cast %9 : i32 to index
    %c2_49 = arith.constant 2 : index
    %c0_50 = arith.constant 0 : index
    %c0_51 = arith.constant 0 : index
    %74 = vector.load %arg7[%73, %c2_49, %c0_50, %c0_51] : memref<2x18x24x128xf32, #tpu.memory_space<vmem>>, vector<1x16x16x128xf32>
    %75 = vector.shape_cast %74 : vector<1x16x16x128xf32> to vector<16x16x128xf32>
    %76 = vector.shape_cast %75 : vector<16x16x128xf32> to vector<256x128xf32>
    %c6 = arith.constant 6 : index
    %c0_52 = arith.constant 0 : index
    %c0_53 = arith.constant 0 : index
    %77 = vector.load %arg3[%c6, %c0_52, %c0_53] : memref<9x128x128xf32, #tpu.memory_space<vmem>>, vector<1x128x128xf32>
    %78 = vector.shape_cast %77 : vector<1x128x128xf32> to vector<128x128xf32>
    %cst_54 = arith.constant dense<0.000000e+00> : vector<256x128xf32>
    %79 = tpu.matmul %76, %78, %cst_54 {dimension_numbers = #tpu.dot_dimension_numbers<[1], [0], [0], [1], [0, 0, 1, 1], [], []>} : vector<256x128xf32>, vector<128x128xf32>, vector<256x128xf32> -> vector<256x128xf32>
    %80 = arith.addf %72, %79 : vector<256x128xf32>
    %81 = arith.index_cast %9 : i32 to index
    %c2_55 = arith.constant 2 : index
    %c1_56 = arith.constant 1 : index
    %c0_57 = arith.constant 0 : index
    %82 = vector.load %arg7[%81, %c2_55, %c1_56, %c0_57] : memref<2x18x24x128xf32, #tpu.memory_space<vmem>>, vector<1x16x16x128xf32>
    %83 = vector.shape_cast %82 : vector<1x16x16x128xf32> to vector<16x16x128xf32>
    %84 = vector.shape_cast %83 : vector<16x16x128xf32> to vector<256x128xf32>
    %c7 = arith.constant 7 : index
    %c0_58 = arith.constant 0 : index
    %c0_59 = arith.constant 0 : index
    %85 = vector.load %arg3[%c7, %c0_58, %c0_59] : memref<9x128x128xf32, #tpu.memory_space<vmem>>, vector<1x128x128xf32>
    %86 = vector.shape_cast %85 : vector<1x128x128xf32> to vector<128x128xf32>
    %cst_60 = arith.constant dense<0.000000e+00> : vector<256x128xf32>
    %87 = tpu.matmul %84, %86, %cst_60 {dimension_numbers = #tpu.dot_dimension_numbers<[1], [0], [0], [1], [0, 0, 1, 1], [], []>} : vector<256x128xf32>, vector<128x128xf32>, vector<256x128xf32> -> vector<256x128xf32>
    %88 = arith.addf %80, %87 : vector<256x128xf32>
    %89 = arith.index_cast %9 : i32 to index
    %c2_61 = arith.constant 2 : index
    %c2_62 = arith.constant 2 : index
    %c0_63 = arith.constant 0 : index
    %90 = vector.load %arg7[%89, %c2_61, %c2_62, %c0_63] : memref<2x18x24x128xf32, #tpu.memory_space<vmem>>, vector<1x16x16x128xf32>
    %91 = vector.shape_cast %90 : vector<1x16x16x128xf32> to vector<16x16x128xf32>
    %92 = vector.shape_cast %91 : vector<16x16x128xf32> to vector<256x128xf32>
    %c8 = arith.constant 8 : index
    %c0_64 = arith.constant 0 : index
    %c0_65 = arith.constant 0 : index
    %93 = vector.load %arg3[%c8, %c0_64, %c0_65] : memref<9x128x128xf32, #tpu.memory_space<vmem>>, vector<1x128x128xf32>
    %94 = vector.shape_cast %93 : vector<1x128x128xf32> to vector<128x128xf32>
    %cst_66 = arith.constant dense<0.000000e+00> : vector<256x128xf32>
    %95 = tpu.matmul %92, %94, %cst_66 {dimension_numbers = #tpu.dot_dimension_numbers<[1], [0], [0], [1], [0, 0, 1, 1], [], []>} : vector<256x128xf32>, vector<128x128xf32>, vector<256x128xf32> -> vector<256x128xf32>
    %96 = arith.addf %88, %95 : vector<256x128xf32>
    %c0_67 = arith.constant 0 : index
    %c0_68 = arith.constant 0 : index
    %97 = vector.load %arg4[%c0_67, %c0_68] : memref<1x128xf32, #tpu.memory_space<vmem>>, vector<1x128xf32>
    %98 = vector.broadcast %97 : vector<1x128xf32> to vector<256x128xf32>
    %99 = arith.mulf %96, %98 : vector<256x128xf32>
    %c0_69 = arith.constant 0 : index
    %c0_70 = arith.constant 0 : index
    %100 = vector.load %arg5[%c0_69, %c0_70] : memref<1x128xf32, #tpu.memory_space<vmem>>, vector<1x128xf32>
    %101 = vector.broadcast %100 : vector<1x128xf32> to vector<256x128xf32>
    %102 = arith.addf %99, %101 : vector<256x128xf32>
    %cst_71 = arith.constant 0.000000e+00 : f32
    %103 = vector.broadcast %cst_71 : f32 to vector<256x128xf32>
    %104 = arith.maximumf %102, %103 : vector<256x128xf32>
    %105 = vector.shape_cast %104 : vector<256x128xf32> to vector<16x16x128xf32>
    %c0_72 = arith.constant 0 : index
    %c0_73 = arith.constant 0 : index
    %c0_74 = arith.constant 0 : index
    %c0_75 = arith.constant 0 : index
    %106 = vector.load %arg6[%c0_72, %c0_73, %c0_74, %c0_75] : memref<1x16x16x128xf32, #tpu.memory_space<vmem>>, vector<1x16x16x128xf32>
    %107 = vector.shape_cast %106 : vector<1x16x16x128xf32> to vector<16x16x128xf32>
    %108 = vector.shape_cast %105 : vector<16x16x128xf32> to vector<1x16x16x128xf32>
    tpu.vector_store %arg6[%c0_72, %c0_73, %c0_74, %c0_75], %108 {strides = array<i32>} : memref<1x16x16x128xf32, #tpu.memory_space<vmem>>, vector<1x16x16x128xf32>,
    return
  }
  func.func @transform_1(%arg0: i32, %arg1: i32) -> (i32, i32, i32) {
    %c0_i32 = arith.constant 0 : i32
    %c0_i32_0 = arith.constant 0 : i32
    %c0_i32_1 = arith.constant 0 : i32
    %c0_i32_2 = arith.constant 0 : i32
    return %c0_i32, %c0_i32_0, %c0_i32_1 : i32, i32, i32
  }
  func.func @transform_2(%arg0: i32, %arg1: i32) -> (i32, i32) {
    %c0_i32 = arith.constant 0 : i32
    %c0_i32_0 = arith.constant 0 : i32
    %c0_i32_1 = arith.constant 0 : i32
    return %c0_i32, %c0_i32_0 : i32, i32
  }
  func.func @transform_3(%arg0: i32, %arg1: i32) -> (i32, i32) {
    %c0_i32 = arith.constant 0 : i32
    %c0_i32_0 = arith.constant 0 : i32
    %c0_i32_1 = arith.constant 0 : i32
    return %c0_i32, %c0_i32_0 : i32, i32
  }
  func.func @transform_4(%arg0: i32, %arg1: i32) -> (i32, i32, i32, i32) {
    %c0_i32 = arith.constant 0 : i32
    %c0_i32_0 = arith.constant 0 : i32
    %c0_i32_1 = arith.constant 0 : i32
    return %arg0, %arg1, %c0_i32, %c0_i32_0 : i32, i32, i32, i32
  }
}

</mosaic_0001>

<bundles_post_ra>
// kernel: tpu_custom_call.1
= control target key start
LH: loop header
LB: loop body
LE: loop exit
PB: predicated region body
PF: predicated region fallthrough
CT: control target
= control target key end

     0   :  { %9 = vsyncpa [#allocation5], 0  ;;  %s3189_s0 = inlined_call_operand.hbm [shape: f32[2,18,24,128], index: 0, kind: input, shape index: {}]   ;;  %s3190_s1 = inlined_call_operand.hbm [shape: f32[9,128,128], index: 1, kind: input, shape index: {}]   ;;  %s3191_s2 = inlined_call_operand.vmem [shape: f32[1,128], index: 2, kind: input, shape index: {}]   ;;  %s3192_s3 = inlined_call_operand.vmem [shape: f32[1,128], index: 3, kind: input, shape index: {}]   ;;  %s3193_s4 = inlined_call_operand.hbm [shape: f32[2,16,16,128], index: 4, kind: output, shape index: {}]  }
   0x1   :  { %10 = vsyncpa [#allocation6], 0 }
   0x2   :  { %12 = vsyncpa [#allocation6 + $0x1], 0  ;;  %s2691_s15 = smov 0   ;;  %s2693_s16 = smov 0  }
   0x3   :  { %s2695_s17 = smov 0   ;;  %s2697_s18 = smov 0  }
   0x4   :  { %s2699_s19 = smov 0   ;;  %s2701_s20 = smov 0  }
   0x5 LB: > { %s2192_s21 = sadd.s32 4294967295, %s2658_s20   ;;  %s2193_s22 = sadd.s32 4294967294, %s2658_s20   ;;  %s2658_s20 = sphi %s2701_s20, %s18_s20   ;;  %s2654_s19 = sphi %s2699_s19, %s3200_s19   ;;  %s2650_s18 = sphi %s2697_s18, %s3199_s18   ;;  %s2646_s17 = sphi %s2695_s17, %s3198_s17   ;;  %s2642_s16 = sphi %s2693_s16, %s3197_s16   ;;  %s2638_s15 = sphi %s2691_s15, %s3196_s15  }
   0x6   : > { %s30_s23 = sadd.s32 1, %s2654_s19  ;;  %s102_s24 = sadd.s32 1, %s2646_s17 }
   0x7   : > { %p32_p0 = scmp.ge.s32.totalorder %s30_s23, 2  ;;  %p112_p1 = scmp.ne.s32.totalorder %s2646_s17, %s2642_s16 }
   0x8   : > { %p113_p2 = scmp.eq.s32.totalorder %s2192_s21, 1  ;;  %p118_p3 = scmp.ne.s32.totalorder %s2642_s16, %s2638_s15 }
   0x9   : > { %s3202_s23 = smov (%p32_p0, %s30_s23), 0  ;;  %p119_p5 = scmp.eq.s32.totalorder %s2193_s22, 1 }
   0xa   : > { %p2731_p4 = por %p113_p2, %p112_p1  ;;  %s97_s26 = ssub.s32 %s2654_s19, %s3202_s23 }
   0xb   : > { %p2194_p6 = scmp.ge.s32.totalorder %s2658_s20, 1  ;;  %p100_p7 = scmp.eq.s32.totalorder %s97_s26, 0 }
   0xc   : > { %p2738_p8 = por %p119_p5, %p118_p3  ;;  %p126_p9 = scmp.lt.s32.totalorder %s2658_s20, 3 }
   0xd   : > { %s2744_s28 = scalar_select %p100_p7, %s2646_s17, %s102_s24  }
   0xe   : > { %p127_p10 = pnand %p2194_p6, %p126_p9  ;;  %p2461_p11 = scmp.eq.s32.totalorder %s2192_s21, 0 }
   0xf   : > { %s137_s5 = sshll.u32 %s3190_s1, 4  ;;  %s2660_s6 = smov [#allocation4]   ;;  %s138_s5 = int_to_ptr.hbm [resolvable:$true] %s137_s5 }
  0x10   : > { %p2453_p12 = pneg %p127_p10  ;;  %s139_s7 = sshll.u32 %s2660_s6, 4  ;;  %s140_s7 = int_to_ptr.vmem [resolvable:$true] %s139_s7 }
  0x11   : > { %s2661_s8 = smov 128   ;;  %s2662_s9 = smov 8  }
  0x12   : > { %p2454_p13 = pnand %p2461_p11, %p2453_p12  ;;  %161 = sbr.rel (%p127_p10) target bundleno = 788 (0x314), region = 32 }
  0x14   : > { %2456 = dma.hbm_to_vmem [thread:$0]  (!%p2454_p13), %s138_s5, 18432, %s140_s7, [#allocation5], %s2661_s8, %s2661_s8, %s2662_s9  }
  0x17   : > { %2627 = dma.done.wait (%p2461_p11), [#allocation5], 18432  }
  0x18   : > { %2629 = vsyncadd (%p2461_p11), [#allocation5], 4294948864  ;;  %s178_s10 = sand.u32 1, %s2642_s16   ;;  %s198_s11 = smul.u32 432, %s2650_s18 }
  0x19   : > { %s2198_s12 = sshll.u32 %s178_s10, 8  ;;  %s2663_s24 = smov [#allocation2]  }
  0x1a   : > { %s199_s21 = scalar_lea.hbm %s3189_s0, %s198_s11  ;;  %s209_s26 = sshll.u32 %s2663_s24, 4  ;;  %s210_s26 = int_to_ptr.vmem [resolvable:$true] %s209_s26 }
  0x1b   : > { %s207_s22 = sshll.u32 %s199_s21, 4  ;;  %s2554_s7 = scalar_lea.hbm %s3189_s0, 864  ;;  %s208_s22 = int_to_ptr.hbm [resolvable:$true] %s207_s22 }
  0x1c   : > { %s2550_s29 = sshra.s32 %s208_s22, 4  ;;  %s2551_s29 = int_to_ptr.hbm [resolvable:$true] %s2550_s29 }
  0x1d   : > { %s2552_s30 = scalar_lea.hbm %s2551_s29, 432  ;;  %p2555_p1 = scmp.lt.s32.totalorder %s2551_s29, %s3189_s0 }
  0x1e   : > { %p2553_p0 = scmp.ne.s32.totalorder %s2551_s29, %s2552_s30  ;;  %p2556_p2 = scmp.lt.s32.totalorder %s2554_s7, %s2552_s30 }
  0x20   : > { %p2557_p3 = por %p2556_p2, %p2555_p1 }
  0x22   : > { %p2558_p5 = pnand %p2557_p3, %p2553_p0 }
  0x24   : > { %2561 = shalt.err (!%p2558_p5)  }
  0x25   : > { %212 = dma.hbm_to_vmem [thread:$0]  %s208_s22, 6912, %s210_s26, [#allocation3] }
  0x26   : > { %s2762_s11 = scalar_lea.vmem [#allocation7], %s2198_s12 }
  0x27   : > { %2630 = dma.done.wait [#allocation3], 6912 }
  0x28   : > { %2631 = vsyncadd [#allocation3], 4294960384  ;;  %v343_v0 = vld [vmem:[#allocation4 + $0xf8] sm:$0xff]  ;;  %v342_v1 = vld [vmem:[#allocation4 + $0xf0] sm:$0xff]  ;;  %s2398_s22 = sshll.u32 %s2650_s18, 8  ;;  %s2084_s30 = sshll.u32 %s2762_s11, 4  ;;  %s2085_s30 = int_to_ptr.vmem [resolvable:$true] %s2084_s30 }
  0x29   : > { %2399 = vmatpush.msra.mxu1 %v343_v0  ;;  %2400 = vmatpush.msra.mxu2 %v343_v0  ;;  %v341_v2 = vld [vmem:[#allocation4 + $0xe8] sm:$0xff]  ;;  %v340_v3 = vld [vmem:[#allocation4 + $0xe0] sm:$0xff]  ;;  %v339_v4 = vld [vmem:[#allocation4 + $0xd8] sm:$0xff]  ;;  %s2083_s29 = scalar_lea.hbm %s3193_s4, %s2398_s22  ;;  %s2069_s18 = scalar_lea.sflag [#allocation6], %s178_s10 }
  0x2a   : > { %2401 = vmatpush.msra.mxu3 %v343_v0  ;;  %344 = vmatpush.msra.mxu0 %v343_v0  ;;  %v338_v5 = vld [vmem:[#allocation4 + $0xd0] sm:$0xff]  ;;  %v337_v6 = vld [vmem:[#allocation4 + $0xc8] sm:$0xff]  ;;  %v336_v7 = vld [vmem:[#allocation4 + $0xc0] sm:$0xff]  ;;  %s2086_s5 = sshll.u32 %s2083_s29, 4  ;;  %s2594_s12 = scalar_lea.hbm %s3193_s4, 512  ;;  %s2087_s5 = int_to_ptr.hbm [resolvable:$true] %s2086_s5 }
  0x2b   : > { %2402 = vmatpush.msra.mxu1 %v342_v1  ;;  %2403 = vmatpush.msra.mxu2 %v342_v1  ;;  %v335_v8 = vld [vmem:[#allocation4 + $0xb8] sm:$0xff]  ;;  %v334_v9 = vld [vmem:[#allocation4 + $0xb0] sm:$0xff]  ;;  %v333_v10 = vld [vmem:[#allocation4 + $0xa8] sm:$0xff]  ;;  %s2588_s6 = sshra.s32 %s2087_s5, 4  ;;  %s2589_s6 = int_to_ptr.hbm [resolvable:$true] %s2588_s6 }
  0x2c   : > { %2404 = vmatpush.msra.mxu3 %v342_v1  ;;  %345 = vmatpush.msra.mxu0 %v342_v1  ;;  %v332_v11 = vld [vmem:[#allocation4 + $0xa0] sm:$0xff]  ;;  %v331_v12 = vld [vmem:[#allocation4 + $0x98] sm:$0xff]  ;;  %v330_v13 = vld [vmem:[#allocation4 + $0x90] sm:$0xff]  ;;  %s2590_s7 = scalar_lea.hbm %s2589_s6, 256  ;;  %p2595_p10 = scmp.lt.s32.totalorder %s2589_s6, %s3193_s4 }
  0x2d   : > { %2405 = vmatpush.msra.mxu1 %v341_v2  ;;  %2406 = vmatpush.msra.mxu2 %v341_v2  ;;  %v329_v14 = vld [vmem:[#allocation4 + $0x88] sm:$0xff]  ;;  %v328_v15 = vld [vmem:[#allocation4 + $0x80] sm:$0xff]  ;;  %v618_v18 = vld [vmem:[#allocation4 + $0x178] sm:$0xff]  ;;  %p2591_p6 = scmp.ne.s32.totalorder %s2589_s6, %s2590_s7  ;;  %p2596_p11 = scmp.lt.s32.totalorder %s2594_s12, %s2590_s7 }
  0x2e   : > { %2407 = vmatpush.msra.mxu3 %v341_v2  ;;  %346 = vmatpush.msra.mxu0 %v341_v2  ;;  %v2764_v16 = vld [vmem:[#allocation2 + $0x61] sm:$0xff]  ;;  %v294_v20 = vld [vmem:[#allocation4 + $0x78] sm:$0xff]  ;;  %v617_v22 = vld [vmem:[#allocation4 + $0x170] sm:$0xff] }
  0x2f   : > { %2408 = vmatpush.msra.mxu1 %v340_v3  ;;  %2409 = vmatpush.msra.mxu2 %v340_v3  ;;  %v2766_v17 = vld [vmem:[#allocation2 + $0xc1] sm:$0xff]  ;;  %v814_v21 = vld [vmem:[#allocation4 + $0x1f8] sm:$0xff]  ;;  %v293_v23 = vld [vmem:[#allocation4 + $0x70] sm:$0xff]  ;;  %p2592_p7 = pnand %p2591_p6, %p2731_p4  ;;  %p2597_p12 = por %p2596_p11, %p2595_p10 }
  0x30   : > { %2410 = vmatpush.msra.mxu3 %v340_v3  ;;  %347 = vmatpush.msra.mxu0 %v340_v3  ;;  %v319_v19 = vld [vmem:[#allocation2 + $0x121] sm:$0xff]  ;;  %v813_v24 = vld [vmem:[#allocation4 + $0x1f0] sm:$0xff]  ;;  %v1008_v29 = vld [vmem:[#allocation4 + $0x278] sm:$0xff] }
  0x31   : > { %2411 = vmatpush.msra.mxu1 %v339_v4  ;;  %2412 = vmatpush.msra.mxu2 %v339_v4  ;;  %v616_v25 = vld [vmem:[#allocation4 + $0x168] sm:$0xff]  ;;  %v615_v32 = vld [vmem:[#allocation4 + $0x160] sm:$0xff]  ;;  %v1007_v35 = vld [vmem:[#allocation4 + $0x270] sm:$0xff]  ;;  %p2593_p9 = pneg %p2592_p7 }
  0x32   : > { %2413 = vmatpush.msra.mxu3 %v339_v4  ;;  %348 = vmatpush.msra.mxu0 %v339_v4  ;;  %v295_v26 = vld [vmem:[#allocation2 + $0x1] sm:$0xff]  ;;  %v2770_v30 = vld [vmem:[#allocation2 + $0x69] sm:$0xff]  ;;  %v614_v37 = vld [vmem:[#allocation4 + $0x158] sm:$0xff] }
  0x33   : > { %2414 = vmatpush.msra.mxu1 %v338_v5  ;;  %2415 = vmatpush.msra.mxu2 %v338_v5  ;;  %v292_v27 = vld [vmem:[#allocation4 + $0x68] sm:$0xff]  ;;  %v811_v33 = vld [vmem:[#allocation4 + $0x1e0] sm:$0xff]  ;;  %v810_v38 = vld [vmem:[#allocation4 + $0x1d8] sm:$0xff]  ;;  %p2598_p13 = pnand %p2597_p12, %p2593_p9 }
  0x34   : > { %2416 = vmatpush.msra.mxu3 %v338_v5  ;;  %349 = vmatpush.msra.mxu0 %v338_v5  ;;  %v812_v28 = vld [vmem:[#allocation4 + $0x1e8] sm:$0xff]  ;;  %v291_v36 = vld [vmem:[#allocation4 + $0x60] sm:$0xff]  ;;  %v290_v40 = vld [vmem:[#allocation4 + $0x58] sm:$0xff] }
  0x35   : > { %2417 = vmatpush.msra.mxu1 %v337_v6  ;;  %2418 = vmatpush.msra.mxu2 %v337_v6  ;;  %v2772_v31 = vld [vmem:[#allocation2 + $0xc9] sm:$0xff]  ;;  %v1005_v44 = vld [vmem:[#allocation4 + $0x260] sm:$0xff]  ;;  %v1004_v51 = vld [vmem:[#allocation4 + $0x258] sm:$0xff] }
  0x36   : > { %2419 = vmatpush.msra.mxu3 %v337_v6  ;;  %350 = vmatpush.msra.mxu0 %v337_v6  ;;  %v320_v34 = vld [vmem:[#allocation2 + $0x129] sm:$0xff]  ;;  %v2776_v46 = vld [vmem:[#allocation2 + $0x79] sm:$0xff]  ;;  %v2784_v62 = vld [vmem:[#allocation2 + $0x81] sm:$0xff] }
  0x37   : > { %2420 = vmatpush.msra.mxu1 %v336_v7  ;;  %2421 = vmatpush.msra.mxu2 %v336_v7  ;;  %v1006_v39 = vld [vmem:[#allocation4 + $0x268] sm:$0xff]  ;;  %v613_v41 = vld [vmem:[#allocation4 + $0x150] sm:$0xff]  ;;  %v2778_v47 = vld [vmem:[#allocation2 + $0xd9] sm:$0xff] }
  0x38   : > { %2422 = vmatpush.msra.mxu3 %v336_v7  ;;  %351 = vmatpush.msra.mxu0 %v336_v7  ;;  %v296_v42 = vld [vmem:[#allocation2 + $0x9] sm:$0xff]  ;;  %v321_v50 = vld [vmem:[#allocation2 + $0x139] sm:$0xff]  ;;  %v2786_v63 = vld [vmem:[#allocation2 + $0xe1] sm:$0xff] }
  0x39   : > { %2423 = vmatpush.msra.mxu1 %v335_v8  ;;  %2424 = vmatpush.msra.mxu2 %v335_v8  ;;  %v809_v43 = vld [vmem:[#allocation4 + $0x1d0] sm:$0xff]  ;;  %v612_v48 = vld [vmem:[#allocation4 + $0x148] sm:$0xff]  ;;  %v611_v53 = vld [vmem:[#allocation4 + $0x140] sm:$0xff] }
  0x3a   : > { %2425 = vmatpush.msra.mxu3 %v335_v8  ;;  %352 = vmatpush.msra.mxu0 %v335_v8  ;;  %v289_v45 = vld [vmem:[#allocation4 + $0x50] sm:$0xff]  ;;  %v808_v49 = vld [vmem:[#allocation4 + $0x1c8] sm:$0xff]  ;;  %v807_v54 = vld [vmem:[#allocation4 + $0x1c0] sm:$0xff] }
  0x3b   : > { %2426 = vmatpush.msra.mxu1 %v334_v9  ;;  %2427 = vmatpush.msra.mxu2 %v334_v9  ;;  %v288_v52 = vld [vmem:[#allocation4 + $0x48] sm:$0xff]  ;;  %v1003_v55 = vld [vmem:[#allocation4 + $0x250] sm:$0xff]  ;;  %v287_v56 = vld [vmem:[#allocation4 + $0x40] sm:$0xff] }
  0x3c   : > { %2428 = vmatpush.msra.mxu3 %v334_v9  ;;  %353 = vmatpush.msra.mxu0 %v334_v9  ;;  %v610_v57 = vld [vmem:[#allocation4 + $0x138] sm:$0xff]  ;;  %v1002_v60 = vld [vmem:[#allocation4 + $0x248] sm:$0xff]  ;;  %v609_v0 = vld [vmem:[#allocation4 + $0x130] sm:$0xff] }
  0x3d   : > { %2429 = vmatpush.msra.mxu1 %v333_v10  ;;  %2430 = vmatpush.msra.mxu2 %v333_v10  ;;  %v2782_v58 = vld [vmem:[#allocation2 + $0x19] sm:$0xff]  ;;  %v805_v1 = vld [vmem:[#allocation4 + $0x1b0] sm:$0xff]  ;;  %v322_v2 = vld [vmem:[#allocation2 + $0x141] sm:$0xff] }
  0x3e   : > { %2431 = vmatpush.msra.mxu3 %v333_v10  ;;  %354 = vmatpush.msra.mxu0 %v333_v10  ;;  %v806_v59 = vld [vmem:[#allocation4 + $0x1b8] sm:$0xff]  ;;  %v1001_v3 = vld [vmem:[#allocation4 + $0x240] sm:$0xff]  ;;  %v285_v4 = vld [vmem:[#allocation4 + $0x30] sm:$0xff] }
  0x3f   : > { %2432 = vmatpush.msra.mxu1 %v332_v11  ;;  %2433 = vmatpush.msra.mxu2 %v332_v11  ;;  %v286_v61 = vld [vmem:[#allocation4 + $0x38] sm:$0xff]  ;;  %v608_v5 = vld [vmem:[#allocation4 + $0x128] sm:$0xff]  ;;  %v607_v9 = vld [vmem:[#allocation4 + $0x120] sm:$0xff] }
  0x40   : > { %2434 = vmatpush.msra.mxu3 %v332_v11  ;;  %355 = vmatpush.msra.mxu0 %v332_v11  ;;  %v804_v6 = vld [vmem:[#allocation4 + $0x1a8] sm:$0xff]  ;;  %v1000_v7 = vld [vmem:[#allocation4 + $0x238] sm:$0xff]  ;;  %v803_v11 = vld [vmem:[#allocation4 + $0x1a0] sm:$0xff] }
  0x41   : > { %2435 = vmatpush.msra.mxu1 %v331_v12  ;;  %2436 = vmatpush.msra.mxu2 %v331_v12  ;;  %v284_v8 = vld [vmem:[#allocation4 + $0x28] sm:$0xff] }
  0x42   : > { %2437 = vmatpush.msra.mxu3 %v331_v12  ;;  %356 = vmatpush.msra.mxu0 %v331_v12  ;;  %v2791_v10 = vld [vmem:[#allocation2 + $0x21] sm:$0xff]  ;;  %v999_v12 = vld [vmem:[#allocation4 + $0x230] sm:$0xff] }
  0x43   : > { %2438 = vmatpush.msra.mxu1 %v330_v13  ;;  %2439 = vmatpush.msra.mxu2 %v330_v13 }
  0x44   : > { %2440 = vmatpush.msra.mxu3 %v330_v13  ;;  %357 = vmatpush.msra.mxu0 %v330_v13  ;;  %v283_v13 = vld [vmem:[#allocation4 + $0x20] sm:$0xff] }
  0x45   : > { %2441 = vmatpush.msra.mxu1 %v329_v14  ;;  %2442 = vmatpush.msra.mxu2 %v329_v14 }
  0x46   : > { %2443 = vmatpush.msra.mxu3 %v329_v14  ;;  %358 = vmatpush.msra.mxu0 %v329_v14  ;;  %v2793_v14 = vld [vmem:[#allocation2 + $0x91] sm:$0xff] }
  0x47   : > { %2444 = vmatpush.msra.mxu1 %v328_v15  ;;  %2445 = vmatpush.msra.mxu2 %v328_v15 }
  0x48   : > { %384 = vmatmul.f32.vlgmr.msra.gmra.mxu1 %v2764_v16  ;;  %408 = vmatmul.f32.vlgmr.msra.gmra.mxu2 %v2766_v17 }
  0x49   : > { %619 = vmatpush.msrb.mxu2 %v618_v18  ;;  %2446 = vmatpush.msra.mxu3 %v328_v15  ;;  %v606_v18 = vld [vmem:[#allocation4 + $0x118] sm:$0xff] }
  0x4a   : > { %432 = vmatmul.f32.vlgmr.msra.gmra.mxu3 %v319_v19  ;;  %457 = vmatpush.msrb.mxu1 %v294_v20  ;;  %v802_v19 = vld [vmem:[#allocation4 + $0x198] sm:$0xff] }
  0x4b   : > { %815 = vmatpush.msrb.mxu3 %v814_v21  ;;  %620 = vmatpush.msrb.mxu2 %v617_v22  ;;  %v323_v20 = vld [vmem:[#allocation2 + $0x151] sm:$0xff]  ;;  %v998_v21 = vld [vmem:[#allocation4 + $0x228] sm:$0xff] }
  0x4c   : > { %458 = vmatpush.msrb.mxu1 %v293_v23  ;;  %359 = vmatpush.msra.mxu0 %v328_v15  ;;  %v2795_v15 = vld [vmem:[#allocation2 + $0xf1] sm:$0xff] }
  0x4d   : > { %816 = vmatpush.msrb.mxu3 %v813_v24  ;;  %621 = vmatpush.msrb.mxu2 %v616_v25  ;;  %v282_v22 = vld [vmem:[#allocation4 + $0x18] sm:$0xff]  ;;  %v605_v23 = vld [vmem:[#allocation4 + $0x110] sm:$0xff]  ;;  %v997_v25 = vld [vmem:[#allocation4 + $0x220] sm:$0xff] }
  0x4e   : > { %360 = vmatmul.f32.vlgmr.msra.gmra.mxu0 %v295_v26  ;;  %459 = vmatpush.msrb.mxu1 %v292_v27  ;;  %v801_v24 = vld [vmem:[#allocation4 + $0x190] sm:$0xff]  ;;  %v604_v27 = vld [vmem:[#allocation4 + $0x108] sm:$0xff] }
  0x4f   : > { %817 = vmatpush.msrb.mxu3 %v812_v28  ;;  %1009 = vmatpush.msrb.mxu0 %v1008_v29  ;;  %v281_v26 = vld [vmem:[#allocation4 + $0x10] sm:$0xff]  ;;  %v800_v29 = vld [vmem:[#allocation4 + $0x188] sm:$0xff] }
  0x50   : > { %387 = vmatmul.f32.gmra.mxu1 %v2770_v30  ;;  %411 = vmatmul.f32.gmra.mxu2 %v2772_v31  ;;  %v2800_v28 = vld [vmem:[#allocation2 + $0x31] sm:$0xff] }
  0x51   : > { %622 = vmatpush.msrb.mxu2 %v615_v32  ;;  %818 = vmatpush.msrb.mxu3 %v811_v33  ;;  %v996_v32 = vld [vmem:[#allocation4 + $0x218] sm:$0xff]  ;;  %v280_v33 = vld [vmem:[#allocation4 + $0x8] sm:$0xff] }
  0x52   : > { %435 = vmatmul.f32.gmra.mxu3 %v320_v34  ;;  %1010 = vmatpush.msrb.mxu0 %v1007_v35  ;;  %v2802_v34 = vld [vmem:[#allocation2 + $0x99] sm:$0xff] }
  0x53   : > { %460 = vmatpush.msrb.mxu1 %v291_v36  ;;  %623 = vmatpush.msrb.mxu2 %v614_v37  ;;  %v2804_v35 = vld [vmem:[#allocation2 + $0xf9] sm:$0xff] }
  0x54   : > { %819 = vmatpush.msrb.mxu3 %v810_v38  ;;  %1011 = vmatpush.msrb.mxu0 %v1006_v39  ;;  %v603_v36 = vld [vmem:[#allocation4 + $0x100] sm:$0xff]  ;;  %v995_v39 = vld [vmem:[#allocation4 + $0x210] sm:$0xff] }
  0x55   : > { %461 = vmatpush.msrb.mxu1 %v290_v40  ;;  %624 = vmatpush.msrb.mxu2 %v613_v41  ;;  %v799_v37 = vld [vmem:[#allocation4 + $0x180] sm:$0xff]  ;;  %v1398_v41 = vld [vmem:[#allocation4 + $0x378] sm:$0xff] }
  0x56   : > { %363 = vmatmul.f32.gmra.mxu0 %v296_v42  ;;  %820 = vmatpush.msrb.mxu3 %v809_v43  ;;  %v324_v38 = vld [vmem:[#allocation2 + $0x159] sm:$0xff]  ;;  %v994_v42 = vld [vmem:[#allocation4 + $0x208] sm:$0xff] }
  0x57   : > { %1012 = vmatpush.msrb.mxu0 %v1005_v44  ;;  %462 = vmatpush.msrb.mxu1 %v289_v45  ;;  %v279_v40 = vld [vmem:[#allocation4] sm:$0xff]  ;;  %v1592_v43 = vld [vmem:[#allocation4 + $0x3f8] sm:$0xff] }
  0x58   : > { %390 = vmatmul.f32.gmra.mxu1 %v2776_v46  ;;  %414 = vmatmul.f32.gmra.mxu2 %v2778_v47  ;;  %v1202_v44 = vld [vmem:[#allocation4 + $0x2f8] sm:$0xff] }
  0x59   : > { %625 = vmatpush.msrb.mxu2 %v612_v48  ;;  %821 = vmatpush.msrb.mxu3 %v808_v49  ;;  %v2809_v45 = vld [vmem:[#allocation2 + $0x39] sm:$0xff]  ;;  %v2811_v49 = vld [vmem:[#allocation2 + $0xa9] sm:$0xff] }
  0x5a   : > { %438 = vmatmul.f32.gmra.mxu3 %v321_v50  ;;  %1013 = vmatpush.msrb.mxu0 %v1004_v51  ;;  %v993_v48 = vld [vmem:[#allocation4 + $0x200] sm:$0xff]  ;;  %v2813_v50 = vld [vmem:[#allocation2 + $0x109] sm:$0xff]  ;;  %v1786_v51 = vld [vmem:[#allocation4 + $0x478] sm:$0xff] }
  0x5b   : > { %463 = vmatpush.msrb.mxu1 %v288_v52  ;;  %626 = vmatpush.msrb.mxu2 %v611_v53  ;;  %v325_v52 = vld [vmem:[#allocation2 + $0x169] sm:$0xff] }
  0x5c   : > { %822 = vmatpush.msrb.mxu3 %v807_v54  ;;  %1014 = vmatpush.msrb.mxu0 %v1003_v55  ;;  %v1397_v53 = vld [vmem:[#allocation4 + $0x370] sm:$0xff] }
  0x5d   : > { %464 = vmatpush.msrb.mxu1 %v287_v56  ;;  %627 = vmatpush.msrb.mxu2 %v610_v57  ;;  %v1591_v54 = vld [vmem:[#allocation4 + $0x3f0] sm:$0xff] }
  0x5e   : > { %366 = vmatmul.f32.gmra.mxu0 %v2782_v58  ;;  %823 = vmatpush.msrb.mxu3 %v806_v59  ;;  %v1201_v55 = vld [vmem:[#allocation4 + $0x2f0] sm:$0xff] }
  0x5f   : > { %1015 = vmatpush.msrb.mxu0 %v1002_v60  ;;  %465 = vmatpush.msrb.mxu1 %v286_v61  ;;  %v2818_v56 = vld [vmem:[#allocation2 + $0x49] sm:$0xff]  ;;  %v2820_v57 = vld [vmem:[#allocation2 + $0xb1] sm:$0xff] }
  0x60   : > { %393 = vmatmul.f32.gmra.mxu1 %v2784_v62  ;;  %417 = vmatmul.f32.gmra.mxu2 %v2786_v63  ;;  %v2822_v59 = vld [vmem:[#allocation2 + $0x111] sm:$0xff] }
  0x61   : > { %628 = vmatpush.msrb.mxu2 %v609_v0  ;;  %824 = vmatpush.msrb.mxu3 %v805_v1  ;;  %v326_v60 = vld [vmem:[#allocation2 + $0x171] sm:$0xff]  ;;  %v247_v1 = vld [vmem:[#allocation2] sm:$0xff] }
  0x62   : > { %441 = vmatmul.f32.gmra.mxu3 %v322_v2  ;;  %1016 = vmatpush.msrb.mxu0 %v1001_v3  ;;  %v1785_v61 = vld [vmem:[#allocation4 + $0x470] sm:$0xff]  ;;  %v570_v2 = vld [vmem:[#allocation2 + $0x2] sm:$0xff]  ;;  %v2199_v3 = vld [vmem:[#allocation2 + $0x18] sm:$0xff] }
  0x63   : > { %466 = vmatpush.msrb.mxu1 %v285_v4  ;;  %629 = vmatpush.msrb.mxu2 %v608_v5  ;;  %v2827_v0 = vld [vmem:[#allocation2 + $0x51] sm:$0xff]  ;;  %v1396_v4 = vld [vmem:[#allocation4 + $0x368] sm:$0xff] }
  0x64   : > { %825 = vmatpush.msrb.mxu3 %v804_v6  ;;  %1017 = vmatpush.msrb.mxu0 %v1000_v7  ;;  %v1590_v5 = vld [vmem:[#allocation4 + $0x3e8] sm:$0xff] }
  0x65   : > { %467 = vmatpush.msrb.mxu1 %v284_v8  ;;  %630 = vmatpush.msrb.mxu2 %v607_v9  ;;  %v1200_v6 = vld [vmem:[#allocation4 + $0x2e8] sm:$0xff]  ;;  %v2200_v9 = vld [vmem:[#allocation2 + $0x20] sm:$0xff] }
  0x66   : > { %369 = vmatmul.f32.gmra.mxu0 %v2791_v10  ;;  %826 = vmatpush.msrb.mxu3 %v803_v11  ;;  %v248_v7 = vld [vmem:[#allocation2 + $0x8] sm:$0xff] }
  0x67   : > { %1018 = vmatpush.msrb.mxu0 %v999_v12  ;;  %468 = vmatpush.msrb.mxu1 %v283_v13  ;;  %v571_v8 = vld [vmem:[#allocation2 + $0xa] sm:$0xff]  ;;  %v572_v12 = vld [vmem:[#allocation2 + $0x1a] sm:$0xff] }
  0x68   : > { %396 = vmatmul.f32.gmra.mxu1 %v2793_v14  ;;  %420 = vmatmul.f32.gmra.mxu2 %v2795_v15  ;;  %v1784_v11 = vld [vmem:[#allocation4 + $0x468] sm:$0xff]  ;;  %v2201_v13 = vld [vmem:[#allocation2 + $0x30] sm:$0xff] }
  0x69   : > { %631 = vmatpush.msrb.mxu2 %v606_v18  ;;  %827 = vmatpush.msrb.mxu3 %v802_v19  ;;  %v1395_v18 = vld [vmem:[#allocation4 + $0x360] sm:$0xff] }
  0x6a   : > { %444 = vmatmul.f32.gmra.mxu3 %v323_v20  ;;  %1019 = vmatpush.msrb.mxu0 %v998_v21  ;;  %v1589_v19 = vld [vmem:[#allocation4 + $0x3e0] sm:$0xff]  ;;  %v2202_v21 = vld [vmem:[#allocation2 + $0x38] sm:$0xff] }
  0x6b   : > { %469 = vmatpush.msrb.mxu1 %v282_v22  ;;  %632 = vmatpush.msrb.mxu2 %v605_v23  ;;  %v1199_v20 = vld [vmem:[#allocation4 + $0x2e0] sm:$0xff]  ;;  %v2203_v23 = vld [vmem:[#allocation2 + $0x48] sm:$0xff] }
  0x6c   : > { %828 = vmatpush.msrb.mxu3 %v801_v24  ;;  %1020 = vmatpush.msrb.mxu0 %v997_v25  ;;  %v1783_v22 = vld [vmem:[#allocation4 + $0x460] sm:$0xff]  ;;  %v1394_v24 = vld [vmem:[#allocation4 + $0x358] sm:$0xff] }
  0x6d   : > { %470 = vmatpush.msrb.mxu1 %v281_v26  ;;  %633 = vmatpush.msrb.mxu2 %v604_v27  ;;  %v1588_v25 = vld [vmem:[#allocation4 + $0x3d8] sm:$0xff] }
  0x6e   : > { %372 = vmatmul.f32.gmra.mxu0 %v2800_v28  ;;  %829 = vmatpush.msrb.mxu3 %v800_v29  ;;  %v1198_v26 = vld [vmem:[#allocation4 + $0x2d8] sm:$0xff] }
  0x6f   : > { %1021 = vmatpush.msrb.mxu0 %v996_v32  ;;  %471 = vmatpush.msrb.mxu1 %v280_v33  ;;  %v575_v27 = vld [vmem:[#allocation2 + $0x3a] sm:$0xff]  ;;  %v576_v32 = vld [vmem:[#allocation2 + $0x4a] sm:$0xff] }
  0x70   : > { %399 = vmatmul.f32.gmra.mxu1 %v2802_v34  ;;  %423 = vmatmul.f32.gmra.mxu2 %v2804_v35  ;;  %v1782_v29 = vld [vmem:[#allocation4 + $0x458] sm:$0xff]  ;;  %v2205_v33 = vld [vmem:[#allocation2 + $0x60] sm:$0xff] }
  0x71   : > { %634 = vmatpush.msrb.mxu2 %v603_v36  ;;  %830 = vmatpush.msrb.mxu3 %v799_v37  ;;  %v1393_v36 = vld [vmem:[#allocation4 + $0x350] sm:$0xff] }
  0x72   : > { %447 = vmatmul.f32.gmra.mxu3 %v324_v38  ;;  %1022 = vmatpush.msrb.mxu0 %v995_v39  ;;  %v1587_v37 = vld [vmem:[#allocation4 + $0x3d0] sm:$0xff] }
  0x73   : > { %472 = vmatpush.msrb.mxu1 %v279_v40  ;;  %1399 = vmatpush.msra.mxu2 %v1398_v41  ;;  %v1197_v38 = vld [vmem:[#allocation4 + $0x2d0] sm:$0xff]  ;;  %v2206_v40 = vld [vmem:[#allocation2 + $0x68] sm:$0xff] }
  0x74   : > { %1023 = vmatpush.msrb.mxu0 %v994_v42  ;;  %1593 = vmatpush.msra.mxu3 %v1592_v43  ;;  %v577_v39 = vld [vmem:[#allocation2 + $0x52] sm:$0xff]  ;;  %v578_v43 = vld [vmem:[#allocation2 + $0x62] sm:$0xff] }
  0x75   : > { %1203 = vmatpush.msra.mxu1 %v1202_v44  ;;  %1400 = vmatpush.msra.mxu2 %v1397_v53  ;;  %v1781_v41 = vld [vmem:[#allocation4 + $0x450] sm:$0xff]  ;;  %v2207_v44 = vld [vmem:[#allocation2 + $0x78] sm:$0xff] }
  0x76   : > { %375 = vmatmul.f32.gmra.mxu0 %v2809_v45  ;;  %1594 = vmatpush.msra.mxu3 %v1591_v54 }
  0x77   : > { %1024 = vmatpush.msrb.mxu0 %v993_v48  ;;  %1204 = vmatpush.msra.mxu1 %v1201_v55  ;;  %v1586_v48 = vld [vmem:[#allocation4 + $0x3c8] sm:$0xff] }
  0x78   : > { %402 = vmatmul.f32.gmra.mxu1 %v2811_v49  ;;  %426 = vmatmul.f32.gmra.mxu2 %v2813_v50  ;;  %v579_v55 = vld [vmem:[#allocation2 + $0x6a] sm:$0xff] }
  0x79   : > { %1787 = vmatpush.msra.mxu0 %v1786_v51  ;;  %1401 = vmatpush.msra.mxu2 %v1396_v4  ;;  %v1585_v4 = vld [vmem:[#allocation4 + $0x3c0] sm:$0xff] }
  0x7a   : > { %450 = vmatmul.f32.gmra.mxu3 %v325_v52  ;;  %1205 = vmatpush.msra.mxu1 %v1200_v6  ;;  %v1196_v52 = vld [vmem:[#allocation4 + $0x2c8] sm:$0xff] }
  0x7b   : > { %1788 = vmatpush.msra.mxu0 %v1785_v61  ;;  %1595 = vmatpush.msra.mxu3 %v1590_v5 }
  0x7c   : > { %1402 = vmatpush.msra.mxu2 %v1395_v18  ;;  %1206 = vmatpush.msra.mxu1 %v1199_v20 }
  0x7d   : > { %1789 = vmatpush.msra.mxu0 %v1784_v11  ;;  %1596 = vmatpush.msra.mxu3 %v1589_v19  ;;  %v581_v11 = vld [vmem:[#allocation2 + $0x82] sm:$0xff] }
  0x7e   : > { %378 = vmatmul.f32.gmra.mxu0 %v2818_v56  ;;  %1403 = vmatpush.msra.mxu2 %v1394_v24  ;;  %v1194_v24 = vld [vmem:[#allocation4 + $0x2b8] sm:$0xff] }
  0x7f   : > { %1790 = vmatpush.msra.mxu0 %v1783_v22  ;;  %1597 = vmatpush.msra.mxu3 %v1588_v25  ;;  %v1584_v22 = vld [vmem:[#allocation4 + $0x3b8] sm:$0xff] }
  0x80   : > { %405 = vmatmul.f32.gmra.mxu1 %v2820_v57  ;;  %429 = vmatmul.f32.gmra.mxu2 %v2822_v59 }
  0x81   : > { %1207 = vmatpush.msra.mxu1 %v1198_v26  ;;  %1791 = vmatpush.msra.mxu0 %v1782_v29 }
  0x82   : > { %453 = vmatmul.f32.gmra.mxu3 %v326_v60  ;;  %1404 = vmatpush.msra.mxu2 %v1393_v36 }
  0x83   : > { %1598 = vmatpush.msra.mxu3 %v1587_v37  ;;  %1208 = vmatpush.msra.mxu1 %v1197_v38  ;;  %v584_v37 = vld [vmem:[#allocation2 + $0xaa] sm:$0xff]  ;;  %v2213_v38 = vld [vmem:[#allocation2 + $0xc0] sm:$0xff] }
  0x84   : > { %1792 = vmatpush.msra.mxu0 %v1781_v41 }
  0x85   : > { %1599 = vmatpush.msra.mxu3 %v1586_v48  ;;  %1209 = vmatpush.msra.mxu1 %v1196_v52  ;;  %v585_v48 = vld [vmem:[#allocation2 + $0xb2] sm:$0xff] }
  0x86   : > { %381 = vmatmul.f32.gmra.mxu0 %v2827_v0  ;;  %v1777_v52 = vld [vmem:[#allocation4 + $0x430] sm:$0xff] }
  0x87   : > { %1600 = vmatpush.msra.mxu3 %v1585_v4 }
  0x88   : > { %473 = vmatmul.f32.vlgmr.msrb.gmra.mxu1 %v247_v1  ;;  %635 = vmatmul.f32.vlgmr.msrb.gmra.mxu2 %v570_v2  ;;  %v580_v2 = vld [vmem:[#allocation2 + $0x7a] sm:$0xff] }
  0x89   : > { %1601 = vmatpush.msra.mxu3 %v1584_v22  ;;  %v587_v22 = vld [vmem:[#allocation2 + $0xca] sm:$0xff] }
  0x8a   : > { %831 = vmatmul.f32.vlgmr.msrb.gmra.mxu3 %v2199_v3 }
  0x8e   : > { %1025 = vmatmul.f32.vlgmr.msrb.gmra.mxu0 %v2782_v58  ;;  %v573_v58 = vld [vmem:[#allocation2 + $0x22] sm:$0xff] }
  0x90   : > { %476 = vmatmul.f32.gmra.mxu1 %v248_v7  ;;  %638 = vmatmul.f32.gmra.mxu2 %v571_v8  ;;  %v1195_v7 = vld [vmem:[#allocation4 + $0x2c0] sm:$0xff] }
  0x91   : > { %1210 = vmatpush.msra.mxu1 %v1195_v7  ;;  %v1582_v7 = vld [vmem:[#allocation4 + $0x3a8] sm:$0xff] }
  0x92   : > { %834 = vmatmul.f32.gmra.mxu3 %v2200_v9 }
  0x93   : > { %1211 = vmatpush.msra.mxu1 %v1194_v24 }
  0x96   : > { %1028 = vmatmul.f32.gmra.mxu0 %v2791_v10  ;;  %v574_v10 = vld [vmem:[#allocation2 + $0x32] sm:$0xff] }
  0x98   : > { %479 = vmatmul.f32.gmra.mxu1 %v2199_v3  ;;  %641 = vmatmul.f32.gmra.mxu2 %v572_v12  ;;  %v2209_v3 = vld [vmem:[#allocation2 + $0x90] sm:$0xff]  ;;  %v1779_v12 = vld [vmem:[#allocation4 + $0x440] sm:$0xff] }
  0x9a   : > { %837 = vmatmul.f32.gmra.mxu3 %v2201_v13 }
  0x9e   : > { %1031 = vmatmul.f32.gmra.mxu0 %v2800_v28  ;;  %v2204_v28 = vld [vmem:[#allocation2 + $0x50] sm:$0xff] }
  0xa0   : > { %482 = vmatmul.f32.gmra.mxu1 %v2200_v9  ;;  %644 = vmatmul.f32.gmra.mxu2 %v573_v58  ;;  %v582_v58 = vld [vmem:[#allocation2 + $0x92] sm:$0xff] }
  0xa2   : > { %840 = vmatmul.f32.gmra.mxu3 %v2202_v21 }
  0xa6   : > { %1034 = vmatmul.f32.gmra.mxu0 %v2809_v45  ;;  %v1392_v45 = vld [vmem:[#allocation4 + $0x348] sm:$0xff] }
  0xa7   : > { %1405 = vmatpush.msra.mxu2 %v1392_v45 }
  0xa8   : > { %485 = vmatmul.f32.gmra.mxu1 %v2201_v13  ;;  %647 = vmatmul.f32.gmra.mxu2 %v574_v10 }
  0xaa   : > { %843 = vmatmul.f32.gmra.mxu3 %v2203_v23 }
  0xae   : > { %1037 = vmatmul.f32.gmra.mxu0 %v2818_v56  ;;  %v1780_v56 = vld [vmem:[#allocation4 + $0x448] sm:$0xff] }
  0xaf   : > { %1793 = vmatpush.msra.mxu0 %v1780_v56 }
  0xb0   : > { %488 = vmatmul.f32.gmra.mxu1 %v2202_v21  ;;  %650 = vmatmul.f32.gmra.mxu2 %v575_v27  ;;  %v2211_v21 = vld [vmem:[#allocation2 + $0xa8] sm:$0xff]  ;;  %v583_v27 = vld [vmem:[#allocation2 + $0x9a] sm:$0xff] }
  0xb1   : > { %1794 = vmatpush.msra.mxu0 %v1779_v12 }
  0xb2   : > { %846 = vmatmul.f32.gmra.mxu3 %v2204_v28 }
  0xb6   : > { %1040 = vmatmul.f32.gmra.mxu0 %v2827_v0 }
  0xb8   : > { %491 = vmatmul.f32.gmra.mxu1 %v2203_v23  ;;  %653 = vmatmul.f32.gmra.mxu2 %v576_v32 }
  0xba   : > { %849 = vmatmul.f32.gmra.mxu3 %v2205_v33 }
  0xbe   : > { %1043 = vmatmul.f32.gmra.mxu0 %v2764_v16 }
  0xc0   : > { %494 = vmatmul.f32.gmra.mxu1 %v2204_v28  ;;  %656 = vmatmul.f32.gmra.mxu2 %v577_v39  ;;  %v1778_v28 = vld [vmem:[#allocation4 + $0x438] sm:$0xff]  ;;  %v1583_v39 = vld [vmem:[#allocation4 + $0x3b0] sm:$0xff] }
  0xc1   : > { %1795 = vmatpush.msra.mxu0 %v1778_v28  ;;  %1602 = vmatpush.msra.mxu3 %v1583_v39 }
  0xc2   : > { %852 = vmatmul.f32.gmra.mxu3 %v2206_v40 }
  0xc3   : > { %1796 = vmatpush.msra.mxu0 %v1777_v52  ;;  %1603 = vmatpush.msra.mxu3 %v1582_v7  ;;  %v1191_v7 = vld [vmem:[#allocation4 + $0x2a0] sm:$0xff] }
  0xc5   : > { %v2837_v42 = vpop.f32.mrf.mxu1 }
  0xc6   : > { %1046 = vmatmul.f32.gmra.mxu0 %v2770_v30  ;;  %v2208_v30 = vld [vmem:[#allocation2 + $0x80] sm:$0xff] }
  0xc8   : > { %497 = vmatmul.f32.gmra.mxu1 %v2205_v33  ;;  %659 = vmatmul.f32.gmra.mxu2 %v578_v43  ;;  %v1193_v43 = vld [vmem:[#allocation4 + $0x2b0] sm:$0xff] }
  0xc9   : > { %1212 = vmatpush.msra.mxu1 %v1193_v43  ;;  %v588_v43 = vld [vmem:[#allocation2 + $0xda] sm:$0xff] }
  0xca   : > { %855 = vmatmul.f32.gmra.mxu3 %v2207_v44 }
  0xcb   : > { %v2840_v51 = vpop.f32.mrf.mxu2  ;;  %v2842_v16 = vpop.f32.mrf.mxu0 }
  0xcd   : > { %v2844_v53 = vpop.f32.mrf.mxu1  ;;  %v2846_v54 = vpop.f32.mrf.mxu3 }
  0xce   : > { %1049 = vmatmul.f32.gmra.mxu0 %v2776_v46  ;;  %v1391_v46 = vld [vmem:[#allocation4 + $0x340] sm:$0xff] }
  0xcf   : > { %1406 = vmatpush.msra.mxu2 %v1391_v46  ;;  %v2215_v46 = vld [vmem:[#allocation2 + $0xd8] sm:$0xff] }
  0xd0   : > { %500 = vmatmul.f32.gmra.mxu1 %v2206_v40  ;;  %662 = vmatmul.f32.gmra.mxu2 %v579_v55 }
  0xd2   : > { %858 = vmatmul.f32.gmra.mxu3 %v2208_v30 }
  0xd3   : > { %v2849_v60 = vpop.f32.mrf.mxu2  ;;  %v2851_v61 = vpop.f32.mrf.mxu0 }
  0xd5   : > { %v2853_v0 = vpop.f32.mrf.mxu1  ;;  %v2855_v1 = vpop.f32.mrf.mxu3 }
  0xd6   : > { %1052 = vmatmul.f32.gmra.mxu0 %v2784_v62  ;;  %v2210_v62 = vld [vmem:[#allocation2 + $0x98] sm:$0xff] }
  0xd8   : > { %503 = vmatmul.f32.gmra.mxu1 %v2207_v44  ;;  %665 = vmatmul.f32.gmra.mxu2 %v580_v2 }
  0xda   : > { %861 = vmatmul.f32.gmra.mxu3 %v2209_v3 }
  0xdb   : > { %v2858_v5 = vpop.f32.mrf.mxu2  ;;  %v2860_v6 = vpop.f32.mrf.mxu0 }
  0xdd   : > { %v2862_v8 = vpop.f32.mrf.mxu1  ;;  %v2864_v9 = vpop.f32.mrf.mxu3 }
  0xde   : > { %1055 = vmatmul.f32.gmra.mxu0 %v2793_v14  ;;  %v1390_v14 = vld [vmem:[#allocation4 + $0x338] sm:$0xff] }
  0xdf   : > { %1407 = vmatpush.msra.mxu2 %v1390_v14 }
  0xe0   : > { %506 = vmatmul.f32.gmra.mxu1 %v2208_v30  ;;  %668 = vmatmul.f32.gmra.mxu2 %v581_v11 }
  0xe2   : > { %864 = vmatmul.f32.gmra.mxu3 %v2210_v62 }
  0xe3   : > { %v2867_v13 = vpop.f32.mrf.mxu2  ;;  %v2869_v18 = vpop.f32.mrf.mxu0 }
  0xe5   : > { %v2871_v19 = vpop.f32.mrf.mxu1  ;;  %v2873_v20 = vpop.f32.mrf.mxu3 }
  0xe6   : > { %1058 = vmatmul.f32.gmra.mxu0 %v2802_v34  ;;  %v2212_v34 = vld [vmem:[#allocation2 + $0xb0] sm:$0xff] }
  0xe8   : > { %509 = vmatmul.f32.gmra.mxu1 %v2209_v3  ;;  %671 = vmatmul.f32.gmra.mxu2 %v582_v58  ;;  %v586_v3 = vld [vmem:[#allocation2 + $0xc2] sm:$0xff] }
  0xe9   : > { %v1192_v58 = vld [vmem:[#allocation4 + $0x2a8] sm:$0xff] }
  0xea   : > { %867 = vmatmul.f32.gmra.mxu3 %v2211_v21  ;;  %1213 = vmatpush.msra.mxu1 %v1192_v58 }
  0xeb   : > { %v2876_v10 = vpop.f32.mrf.mxu2  ;;  %v2878_v23 = vpop.f32.mrf.mxu0 }
  0xec   : > { %1214 = vmatpush.msra.mxu1 %v1191_v7 }
  0xed   : > { %v2880_v25 = vpop.f32.mrf.mxu1  ;;  %v2882_v26 = vpop.f32.mrf.mxu3 }
  0xee   : > { %1061 = vmatmul.f32.gmra.mxu0 %v2811_v49  ;;  %v1389_v49 = vld [vmem:[#allocation4 + $0x330] sm:$0xff] }
  0xef   : > { %1408 = vmatpush.msra.mxu2 %v1389_v49 }
  0xf0   : > { %512 = vmatmul.f32.gmra.mxu1 %v2210_v62  ;;  %674 = vmatmul.f32.gmra.mxu2 %v583_v27 }
  0xf2   : > { %870 = vmatmul.f32.gmra.mxu3 %v2212_v34 }
  0xf3   : > { %v2885_v29 = vpop.f32.mrf.mxu2  ;;  %v2887_v32 = vpop.f32.mrf.mxu0 }
  0xf5   : > { %v2889_v33 = vpop.f32.mrf.mxu1  ;;  %v2891_v36 = vpop.f32.mrf.mxu3 }
  0xf6   : > { %1064 = vmatmul.f32.gmra.mxu0 %v2820_v57  ;;  %v2214_v57 = vld [vmem:[#allocation2 + $0xc8] sm:$0xff] }
  0xf8   : > { %515 = vmatmul.f32.gmra.mxu1 %v2211_v21  ;;  %677 = vmatmul.f32.gmra.mxu2 %v584_v37 }
  0xfa   : > { %873 = vmatmul.f32.gmra.mxu3 %v2213_v38 }
  0xfb   : > { %v2894_v40 = vpop.f32.mrf.mxu2  ;;  %v2896_v41 = vpop.f32.mrf.mxu0 }
  0xfd   : > { %v2898_v44 = vpop.f32.mrf.mxu1  ;;  %v2900_v45 = vpop.f32.mrf.mxu3 }
  0xfe   : > { %1067 = vmatmul.f32.gmra.mxu0 %v2766_v17  ;;  %v1388_v17 = vld [vmem:[#allocation4 + $0x328] sm:$0xff] }
  0xff   : > { %1409 = vmatpush.msra.mxu2 %v1388_v17 }
 0x100   : > { %518 = vmatmul.f32.gmra.mxu1 %v2212_v34  ;;  %680 = vmatmul.f32.gmra.mxu2 %v585_v48  ;;  %v1776_v34 = vld [vmem:[#allocation4 + $0x428] sm:$0xff] }
 0x101   : > { %1797 = vmatpush.msra.mxu0 %v1776_v34 }
 0x102   : > { %876 = vmatmul.f32.gmra.mxu3 %v2214_v57 }
 0x103   : > { %v2903_v55 = vpop.f32.mrf.mxu2  ;;  %v2905_v30 = vpop.f32.mrf.mxu0 }
 0x105   : > { %v2907_v56 = vpop.f32.mrf.mxu3  ;;  %v474_v2 = vpop.f32.mrf.mxu1 }
 0x106   : > { %1070 = vmatmul.f32.gmra.mxu0 %v2772_v31  ;;  %v475_v4 = vadd.f32 %v474_v2, %v2842_v16  ;;  %v2216_v31 = vld [vmem:[#allocation2 + $0xe0] sm:$0xff] }
 0x107   : > { %v1581_v2 = vld [vmem:[#allocation4 + $0x3a0] sm:$0xff] }
 0x108   : > { %521 = vmatmul.f32.gmra.mxu1 %v2213_v38  ;;  %683 = vmatmul.f32.gmra.mxu2 %v586_v3 }
 0x109   : > { %1604 = vmatpush.msra.mxu3 %v1581_v2 }
 0x10a   : > { %879 = vmatmul.f32.gmra.mxu3 %v2215_v46 }
 0x10b   : > { %v636_v11 = vpop.f32.mrf.mxu2  ;;  %v1026_v62 = vpop.f32.mrf.mxu0 }
 0x10c   : > { %v732_v12 = vadd.f32 %v636_v11, %v475_v4 }
 0x10d   : > { %v477_v21 = vpop.f32.mrf.mxu1  ;;  %v832_v14 = vpop.f32.mrf.mxu3 }
 0x10e   : > { %v928_v24 = vadd.f32 %v832_v14, %v732_v12  ;;  %1073 = vmatmul.f32.gmra.mxu0 %v2778_v47  ;;  %v478_v16 = vadd.f32 %v477_v21, %v2851_v61  ;;  %v2217_v47 = vld [vmem:[#allocation2 + $0xf0] sm:$0xff]  ;;  %v589_v12 = vld [vmem:[#allocation2 + $0xe2] sm:$0xff] }
 0x10f   : > { %v1775_v21 = vld [vmem:[#allocation4 + $0x420] sm:$0xff] }
 0x110   : > { %v2912_v27 = vadd.f32 %v1026_v62, %v928_v24  ;;  %524 = vmatmul.f32.gmra.mxu1 %v2214_v57  ;;  %686 = vmatmul.f32.gmra.mxu2 %v587_v22  ;;  %v1387_v57 = vld [vmem:[#allocation4 + $0x320] sm:$0xff] }
 0x111   : > { %1410 = vmatpush.msra.mxu2 %v1387_v57  ;;  %1798 = vmatpush.msra.mxu0 %v1775_v21  ;;  %v1190_v57 = vld [vmem:[#allocation4 + $0x298] sm:$0xff] }
 0x112   : > { %882 = vmatmul.f32.gmra.mxu3 %v2216_v31  ;;  %1215 = vmatpush.msra.mxu1 %v1190_v57 }
 0x113   : > { %v639_v28 = vpop.f32.mrf.mxu2  ;;  %v1029_v37 = vpop.f32.mrf.mxu0 }
 0x114   : > { %v733_v38 = vadd.f32 %v639_v28, %v478_v16  ;;  %v590_v28 = vld [vmem:[#allocation2 + $0xf2] sm:$0xff] }
 0x115   : > { %v480_v49 = vpop.f32.mrf.mxu1  ;;  %v835_v39 = vpop.f32.mrf.mxu3 }
 0x116   : > { %v929_v48 = vadd.f32 %v835_v39, %v733_v38  ;;  %1076 = vmatmul.f32.gmra.mxu0 %v2786_v63  ;;  %v481_v61 = vadd.f32 %v480_v49, %v2860_v6  ;;  %v1580_v49 = vld [vmem:[#allocation4 + $0x398] sm:$0xff] }
 0x117   : > { %1605 = vmatpush.msra.mxu3 %v1580_v49 }
 0x118   : > { %v2916_v52 = vadd.f32 %v1029_v37, %v929_v48  ;;  %527 = vmatmul.f32.gmra.mxu1 %v2215_v46  ;;  %689 = vmatmul.f32.gmra.mxu2 %v588_v43  ;;  %v2218_v46 = vld [vmem:[#allocation2 + $0xf8] sm:$0xff] }
 0x11a   : > { %885 = vmatmul.f32.gmra.mxu3 %v2217_v47 }
 0x11b   : > { %v642_v3 = vpop.f32.mrf.mxu2  ;;  %v1032_v17 = vpop.f32.mrf.mxu0 }
 0x11c   : > { %v734_v4 = vadd.f32 %v642_v3, %v481_v61  ;;  %v591_v3 = vld [vmem:[#allocation2 + $0xfa] sm:$0xff] }
 0x11d   : > { %v483_v11 = vpop.f32.mrf.mxu1  ;;  %v838_v62 = vpop.f32.mrf.mxu3 }
 0x11e   : > { %v930_v63 = vadd.f32 %v838_v62, %v734_v4  ;;  %1079 = vmatmul.f32.gmra.mxu0 %v2795_v15  ;;  %v484_v6 = vadd.f32 %v483_v11, %v2869_v18  ;;  %v2219_v15 = vld [vmem:[#allocation2 + $0x108] sm:$0xff]  ;;  %v1774_v4 = vld [vmem:[#allocation4 + $0x418] sm:$0xff] }
 0x11f   : > { %1799 = vmatpush.msra.mxu0 %v1774_v4 }
 0x120   : > { %v2920_v58 = vadd.f32 %v1032_v17, %v930_v63  ;;  %530 = vmatmul.f32.gmra.mxu1 %v2216_v31  ;;  %692 = vmatmul.f32.gmra.mxu2 %v589_v12  ;;  %v1386_v31 = vld [vmem:[#allocation4 + $0x318] sm:$0xff] }
 0x121   : > { %1411 = vmatpush.msra.mxu2 %v1386_v31 }
 0x122   : > { %888 = vmatmul.f32.gmra.mxu3 %v2218_v46 }
 0x123   : > { %v645_v14 = vpop.f32.mrf.mxu2  ;;  %v1035_v22 = vpop.f32.mrf.mxu0 }
 0x124   : > { %v735_v24 = vadd.f32 %v645_v14, %v484_v6  ;;  %v592_v6 = vld [vmem:[#allocation2 + $0x10a] sm:$0xff] }
 0x125   : > { %v486_v16 = vpop.f32.mrf.mxu1  ;;  %v841_v34 = vpop.f32.mrf.mxu3 }
 0x126   : > { %v931_v37 = vadd.f32 %v841_v34, %v735_v24  ;;  %1082 = vmatmul.f32.gmra.mxu0 %v2804_v35  ;;  %v487_v18 = vadd.f32 %v486_v16, %v2878_v23  ;;  %v2253_v34 = vld [vmem:[#allocation2 + $0x121] sm:$0xff] }
 0x128   : > { %v2924_v38 = vadd.f32 %v1035_v22, %v931_v37  ;;  %533 = vmatmul.f32.gmra.mxu1 %v2217_v47  ;;  %695 = vmatmul.f32.gmra.mxu2 %v590_v28  ;;  %v2220_v47 = vld [vmem:[#allocation2 + $0x110] sm:$0xff] }
 0x129   : > { %v1579_v22 = vld [vmem:[#allocation4 + $0x390] sm:$0xff] }
 0x12a   : > { %891 = vmatmul.f32.gmra.mxu3 %v2219_v15  ;;  %v1189_v37 = vld [vmem:[#allocation4 + $0x290] sm:$0xff] }
 0x12b   : > { %v648_v39 = vpop.f32.mrf.mxu2  ;;  %v1038_v43 = vpop.f32.mrf.mxu0  ;;  %1606 = vmatpush.msra.mxu3 %v1579_v22  ;;  %1216 = vmatpush.msra.mxu1 %v1189_v37 }
 0x12c   : > { %v736_v48 = vadd.f32 %v648_v39, %v487_v18 }
 0x12d   : > { %v489_v61 = vpop.f32.mrf.mxu1  ;;  %v844_v2 = vpop.f32.mrf.mxu3 }
 0x12e   : > { %v932_v35 = vadd.f32 %v844_v2, %v736_v48  ;;  %1085 = vmatmul.f32.gmra.mxu0 %v2813_v50  ;;  %v490_v23 = vadd.f32 %v489_v61, %v2887_v32  ;;  %v2221_v50 = vld [vmem:[#allocation2 + $0x120] sm:$0xff]  ;;  %v2254_v61 = vld [vmem:[#allocation2 + $0x129] sm:$0xff] }
 0x130   : > { %v2928_v17 = vadd.f32 %v1038_v43, %v932_v35  ;;  %536 = vmatmul.f32.gmra.mxu1 %v2218_v46  ;;  %698 = vmatmul.f32.gmra.mxu2 %v591_v3  ;;  %v1385_v46 = vld [vmem:[#allocation4 + $0x310] sm:$0xff] }
 0x131   : > { %1412 = vmatpush.msra.mxu2 %v1385_v46  ;;  %v1773_v43 = vld [vmem:[#allocation4 + $0x410] sm:$0xff]  ;;  %v1188_v46 = vld [vmem:[#allocation4 + $0x288] sm:$0xff] }
 0x132   : > { %894 = vmatmul.f32.gmra.mxu3 %v2220_v47  ;;  %1800 = vmatpush.msra.mxu0 %v1773_v43  ;;  %v596_v43 = vld [vmem:[#allocation2 + $0x13a] sm:$0xff] }
 0x133   : > { %v651_v7 = vpop.f32.mrf.mxu2  ;;  %v1041_v11 = vpop.f32.mrf.mxu0  ;;  %1217 = vmatpush.msra.mxu1 %v1188_v46 }
 0x134   : > { %v737_v62 = vadd.f32 %v651_v7, %v490_v23  ;;  %v594_v23 = vld [vmem:[#allocation2 + $0x122] sm:$0xff]  ;;  %v2223_v7 = vld [vmem:[#allocation2 + $0x138] sm:$0xff] }
 0x135   : > { %v492_v12 = vpop.f32.mrf.mxu1  ;;  %v847_v63 = vpop.f32.mrf.mxu3 }
 0x136   : > { %v933_v21 = vadd.f32 %v847_v63, %v737_v62  ;;  %1088 = vmatmul.f32.gmra.mxu0 %v2822_v59  ;;  %v493_v32 = vadd.f32 %v492_v12, %v2896_v41  ;;  %v593_v59 = vld [vmem:[#allocation2 + $0x112] sm:$0xff]  ;;  %v1578_v62 = vld [vmem:[#allocation4 + $0x388] sm:$0xff] }
 0x137   : > { %1607 = vmatpush.msra.mxu3 %v1578_v62 }
 0x138   : > { %v2932_v14 = vadd.f32 %v1041_v11, %v933_v21  ;;  %539 = vmatmul.f32.gmra.mxu1 %v2219_v15  ;;  %701 = vmatmul.f32.gmra.mxu2 %v592_v6  ;;  %v2222_v15 = vld [vmem:[#allocation2 + $0x128] sm:$0xff]  ;;  %v2255_v6 = vld [vmem:[#allocation2 + $0x139] sm:$0xff] }
 0x13a   : > { %897 = vmatmul.f32.gmra.mxu3 %v2221_v50 }
 0x13b   : > { %v654_v24 = vpop.f32.mrf.mxu2  ;;  %v1044_v16 = vpop.f32.mrf.mxu0 }
 0x13c   : > { %v738_v28 = vadd.f32 %v654_v24, %v493_v32  ;;  %v595_v24 = vld [vmem:[#allocation2 + $0x12a] sm:$0xff] }
 0x13d   : > { %v495_v31 = vpop.f32.mrf.mxu1  ;;  %v850_v18 = vpop.f32.mrf.mxu3 }
 0x13e   : > { %v934_v49 = vadd.f32 %v850_v18, %v738_v28  ;;  %1091 = vmatmul.f32.gmra.mxu0 %v2253_v34  ;;  %v496_v41 = vadd.f32 %v495_v31, %v2905_v30  ;;  %v1772_v28 = vld [vmem:[#allocation4 + $0x408] sm:$0xff] }
 0x13f   : > { %v2256_v18 = vld [vmem:[#allocation2 + $0x141] sm:$0xff]  ;;  %1801 = vmatpush.msra.mxu0 %v1772_v28  ;;  %v598_v28 = vld [vmem:[#allocation2 + $0x152] sm:$0xff] }
 0x140   : > { %v2935_v39 = vadd.f32 %v1044_v16, %v934_v49  ;;  %542 = vmatmul.f32.gmra.mxu1 %v2220_v47  ;;  %704 = vmatmul.f32.gmra.mxu2 %v593_v59  ;;  %v1384_v47 = vld [vmem:[#allocation4 + $0x308] sm:$0xff] }
 0x141   : > { %1413 = vmatpush.msra.mxu2 %v1384_v47  ;;  %v1187_v47 = vld [vmem:[#allocation4 + $0x280] sm:$0xff] }
 0x142   : > { %900 = vmatmul.f32.gmra.mxu3 %v2222_v15  ;;  %1218 = vmatpush.msra.mxu1 %v1187_v47 }
 0x143   : > { %v657_v48 = vpop.f32.mrf.mxu2  ;;  %v1047_v57 = vpop.f32.mrf.mxu0 }
 0x144   : > { %v739_v2 = vadd.f32 %v657_v48, %v496_v41 }
 0x145   : > { %v498_v3 = vpop.f32.mrf.mxu1  ;;  %v853_v35 = vpop.f32.mrf.mxu3 }
 0x146   : > { %v935_v4 = vadd.f32 %v853_v35, %v739_v2  ;;  %1094 = vmatmul.f32.gmra.mxu0 %v2254_v61  ;;  %v499_v30 = vadd.f32 %v498_v3, %v2837_v42  ;;  %v1577_v2 = vld [vmem:[#allocation4 + $0x380] sm:$0xff] }
 0x147   : > { %1608 = vmatpush.msra.mxu3 %v1577_v2  ;;  %v2228_v2 = vld [vmem:[#allocation2 + $0x170] sm:$0xff] }
 0x148   : > { %v2938_v11 = vadd.f32 %v1047_v57, %v935_v4  ;;  %545 = vmatmul.f32.gmra.mxu1 %v2221_v50  ;;  %707 = vmatmul.f32.gmra.mxu2 %v594_v23  ;;  %v2224_v50 = vld [vmem:[#allocation2 + $0x140] sm:$0xff]  ;;  %v2225_v57 = vld [vmem:[#allocation2 + $0x150] sm:$0xff] }
 0x149   : > { %v2257_v23 = vld [vmem:[#allocation2 + $0x151] sm:$0xff] }
 0x14a   : > { %903 = vmatmul.f32.gmra.mxu3 %v2223_v7 }
 0x14b   : > { %v660_v12 = vpop.f32.mrf.mxu2  ;;  %v1050_v63 = vpop.f32.mrf.mxu0 }
 0x14c   : > { %v740_v21 = vadd.f32 %v660_v12, %v499_v30  ;;  %v597_v12 = vld [vmem:[#allocation2 + $0x142] sm:$0xff] }
 0x14d   : > { %v501_v32 = vpop.f32.mrf.mxu1  ;;  %v856_v22 = vpop.f32.mrf.mxu3 }
 0x14e   : > { %v936_v16 = vadd.f32 %v856_v22, %v740_v21  ;;  %1097 = vmatmul.f32.gmra.mxu0 %v2255_v6  ;;  %v502_v42 = vadd.f32 %v501_v32, %v2844_v53  ;;  %v1771_v21 = vld [vmem:[#allocation4 + $0x400] sm:$0xff] }
 0x14f   : > { %v2258_v22 = vld [vmem:[#allocation2 + $0x159] sm:$0xff]  ;;  %1802 = vmatpush.msra.mxu0 %v1771_v21 }
 0x150   : > { %v2941_v34 = vadd.f32 %v1050_v63, %v936_v16  ;;  %548 = vmatmul.f32.gmra.mxu1 %v2222_v15  ;;  %710 = vmatmul.f32.gmra.mxu2 %v595_v24  ;;  %v1383_v15 = vld [vmem:[#allocation4 + $0x300] sm:$0xff] }
 0x151   : > { %1414 = vmatpush.msra.mxu2 %v1383_v15  ;;  %v599_v15 = vld [vmem:[#allocation2 + $0x15a] sm:$0xff] }
 0x152   : > { %906 = vmatmul.f32.gmra.mxu3 %v2224_v50 }
 0x153   : > { %v663_v37 = vpop.f32.mrf.mxu2  ;;  %v1053_v31 = vpop.f32.mrf.mxu0 }
 0x154   : > { %v741_v59 = vadd.f32 %v663_v37, %v502_v42 }
 0x155   : > { %v504_v49 = vpop.f32.mrf.mxu1  ;;  %v859_v41 = vpop.f32.mrf.mxu3 }
 0x156   : > { %v937_v48 = vadd.f32 %v859_v41, %v741_v59  ;;  %1100 = vmatmul.f32.gmra.mxu0 %v2256_v18  ;;  %v505_v53 = vadd.f32 %v504_v49, %v2853_v0  ;;  %v2259_v49 = vld [vmem:[#allocation2 + $0x169] sm:$0xff] }
 0x158   : > { %v2944_v61 = vadd.f32 %v1053_v31, %v937_v48  ;;  %551 = vmatmul.f32.gmra.mxu1 %v2223_v7  ;;  %713 = vmatmul.f32.gmra.mxu2 %v596_v43  ;;  %v2226_v7 = vld [vmem:[#allocation2 + $0x158] sm:$0xff]  ;;  %v2227_v31 = vld [vmem:[#allocation2 + $0x168] sm:$0xff] }
 0x15a   : > { %909 = vmatmul.f32.gmra.mxu3 %v2225_v57 }
 0x15b   : > { %v666_v3 = vpop.f32.mrf.mxu2  ;;  %v1056_v35 = vpop.f32.mrf.mxu0 }
 0x15c   : > { %v742_v4 = vadd.f32 %v666_v3, %v505_v53 }
 0x15d   : > { %v507_v30 = vpop.f32.mrf.mxu1  ;;  %v862_v62 = vpop.f32.mrf.mxu3 }
 0x15e   : > { %v938_v63 = vadd.f32 %v862_v62, %v742_v4  ;;  %1103 = vmatmul.f32.gmra.mxu0 %v2257_v23  ;;  %v508_v0 = vadd.f32 %v507_v30, %v2862_v8  ;;  %v2260_v23 = vld [vmem:[#allocation2 + $0x171] sm:$0xff] }
 0x15f   : > { %v600_v62 = vld [vmem:[#allocation2 + $0x16a] sm:$0xff] }
 0x160   : > { %v2947_v6 = vadd.f32 %v1056_v35, %v938_v63  ;;  %554 = vmatmul.f32.gmra.mxu1 %v2224_v50  ;;  %716 = vmatmul.f32.gmra.mxu2 %v597_v12  ;;  %v2229_v63 = vld [vmem:[#allocation2 + $0x180] sm:$0xff] }
 0x162   : > { %912 = vmatmul.f32.gmra.mxu3 %v2226_v7 }
 0x163   : > { %v669_v46 = vpop.f32.mrf.mxu2  ;;  %v1059_v32 = vpop.f32.mrf.mxu0 }
 0x164   : > { %v743_v24 = vadd.f32 %v669_v46, %v508_v0  ;;  %v2261_v46 = vld [vmem:[#allocation2 + $0x181] sm:$0xff] }
 0x165   : > { %v510_v16 = vpop.f32.mrf.mxu1  ;;  %v865_v42 = vpop.f32.mrf.mxu3 }
 0x166   : > { %v939_v37 = vadd.f32 %v865_v42, %v743_v24  ;;  %1106 = vmatmul.f32.gmra.mxu0 %v2258_v22  ;;  %v511_v50 = vadd.f32 %v510_v16, %v2871_v19  ;;  %v601_v16 = vld [vmem:[#allocation2 + $0x172] sm:$0xff] }
 0x168   : > { %v2950_v18 = vadd.f32 %v1059_v32, %v939_v37  ;;  %557 = vmatmul.f32.gmra.mxu1 %v2225_v57  ;;  %719 = vmatmul.f32.gmra.mxu2 %v598_v28  ;;  %v2230_v28 = vld [vmem:[#allocation2 + $0x188] sm:$0xff] }
 0x16a   : > { %915 = vmatmul.f32.gmra.mxu3 %v2227_v31 }
 0x16b   : > { %v672_v8 = vpop.f32.mrf.mxu2  ;;  %v1062_v59 = vpop.f32.mrf.mxu0 }
 0x16c   : > { %v744_v41 = vadd.f32 %v672_v8, %v511_v50  ;;  %v2262_v8 = vld [vmem:[#allocation2 + $0x189] sm:$0xff] }
 0x16d   : > { %v513_v43 = vpop.f32.mrf.mxu1  ;;  %v868_v48 = vpop.f32.mrf.mxu3 }
 0x16e   : > { %v940_v53 = vadd.f32 %v868_v48, %v744_v41  ;;  %1109 = vmatmul.f32.gmra.mxu0 %v2259_v49  ;;  %v514_v57 = vadd.f32 %v513_v43, %v2880_v25  ;;  %v2263_v43 = vld [vmem:[#allocation2 + $0x1a] sm:$0xff]  ;;  %v2295_v48 = vld [vmem:[#allocation2 + $0x30] sm:$0xff] }
 0x170   : > { %v2953_v3 = vadd.f32 %v1062_v59, %v940_v53  ;;  %560 = vmatmul.f32.gmra.mxu1 %v2226_v7  ;;  %722 = vmatmul.f32.gmra.mxu2 %v599_v15  ;;  %v2327_v53 = vld [vmem:[#allocation2 + $0x31] sm:$0xff] }
 0x172   : > { %918 = vmatmul.f32.gmra.mxu3 %v2228_v2 }
 0x173   : > { %v675_v35 = vpop.f32.mrf.mxu2  ;;  %v1065_v19 = vpop.f32.mrf.mxu0 }
 0x174   : > { %v745_v4 = vadd.f32 %v675_v35, %v514_v57 }
 0x175   : > { %v516_v47 = vpop.f32.mrf.mxu1  ;;  %v871_v30 = vpop.f32.mrf.mxu3 }
 0x176   : > { %v941_v12 = vadd.f32 %v871_v30, %v745_v4  ;;  %1112 = vmatmul.f32.gmra.mxu0 %v2260_v23  ;;  %v517_v7 = vadd.f32 %v516_v47, %v2889_v33  ;;  %v2264_v30 = vld [vmem:[#allocation2 + $0x22] sm:$0xff] }
 0x178   : > { %v2956_v0 = vadd.f32 %v1065_v19, %v941_v12  ;;  %563 = vmatmul.f32.gmra.mxu1 %v2227_v31  ;;  %725 = vmatmul.f32.gmra.mxu2 %v600_v62  ;;  %v2359_v19 = vld [vmem:[#allocation2 + $0x32] sm:$0xff] }
 0x179   : > { %v2296_v62 = vld [vmem:[#allocation2 + $0x38] sm:$0xff] }
 0x17a   : > { %921 = vmatmul.f32.gmra.mxu3 %v2229_v63  ;;  %v2328_v63 = vld [vmem:[#allocation2 + $0x39] sm:$0xff] }
 0x17b   : > { %v678_v21 = vpop.f32.mrf.mxu2  ;;  %v1068_v25 = vpop.f32.mrf.mxu0 }
 0x17c   : > { %v746_v32 = vadd.f32 %v678_v21, %v517_v7 }
 0x17d   : > { %v519_v22 = vpop.f32.mrf.mxu1  ;;  %v874_v24 = vpop.f32.mrf.mxu3 }
 0x17e   : > { %v942_v42 = vadd.f32 %v874_v24, %v746_v32  ;;  %1115 = vmatmul.f32.gmra.mxu0 %v2261_v46  ;;  %v520_v31 = vadd.f32 %v519_v22, %v2898_v44  ;;  %v2360_v46 = vld [vmem:[#allocation2 + $0x3a] sm:$0xff] }
 0x180   : > { %v2959_v37 = vadd.f32 %v1068_v25, %v942_v42  ;;  %566 = vmatmul.f32.gmra.mxu1 %v2228_v2  ;;  %728 = vmatmul.f32.gmra.mxu2 %v601_v16  ;;  %v2297_v16 = vld [vmem:[#allocation2 + $0x48] sm:$0xff] }
 0x182   : > { %924 = vmatmul.f32.gmra.mxu3 %v2230_v28  ;;  %v2329_v28 = vld [vmem:[#allocation2 + $0x49] sm:$0xff] }
 0x183   : > { %v681_v50 = vpop.f32.mrf.mxu2  ;;  %v1071_v33 = vpop.f32.mrf.mxu0 }
 0x184   : > { %v747_v59 = vadd.f32 %v681_v50, %v520_v31 }
 0x185   : > { %v522_v49 = vpop.f32.mrf.mxu1  ;;  %v877_v41 = vpop.f32.mrf.mxu3 }
 0x186   : > { %v943_v15 = vadd.f32 %v877_v41, %v747_v59  ;;  %1118 = vmatmul.f32.gmra.mxu0 %v2262_v8  ;;  %v523_v2 = vadd.f32 %v522_v49, %v2840_v51  ;;  %v2361_v8 = vld [vmem:[#allocation2 + $0x4a] sm:$0xff] }
 0x188   : > { %v2962_v57 = vadd.f32 %v1071_v33, %v943_v15  ;;  %1219 = vmatmul.f32.vlgmr.msra.gmra.mxu1 %v2263_v43  ;;  %1415 = vmatmul.f32.vlgmr.msra.gmra.mxu2 %v2295_v48  ;;  %v2298_v43 = vld [vmem:[#allocation2 + $0x50] sm:$0xff] }
 0x189   : > { %v2330_v15 = vld [vmem:[#allocation2 + $0x51] sm:$0xff] }
 0x18a   : > { %1609 = vmatmul.f32.vlgmr.msra.gmra.mxu3 %v2327_v53 }
 0x18b   : > { %v684_v44 = vpop.f32.mrf.mxu2  ;;  %v1074_v35 = vpop.f32.mrf.mxu0 }
 0x18c   : > { %v748_v23 = vadd.f32 %v684_v44, %v523_v2 }
 0x18d   : > { %v525_v4 = vpop.f32.mrf.mxu1  ;;  %v880_v47 = vpop.f32.mrf.mxu3 }
 0x18e   : > { %v944_v12 = vadd.f32 %v880_v47, %v748_v23  ;;  %1803 = vmatmul.f32.vlgmr.msra.gmra.mxu0 %v2359_v19  ;;  %v526_v21 = vadd.f32 %v525_v4, %v2849_v60  ;;  %v2299_v47 = vld [vmem:[#allocation2 + $0x60] sm:$0xff] }
 0x190   : > { %v2965_v7 = vadd.f32 %v1074_v35, %v944_v12  ;;  %1222 = vmatmul.f32.gmra.mxu1 %v2264_v30  ;;  %1418 = vmatmul.f32.gmra.mxu2 %v2296_v62  ;;  %v2362_v35 = vld [vmem:[#allocation2 + $0x52] sm:$0xff]  ;;  %v2331_v62 = vld [vmem:[#allocation2 + $0x61] sm:$0xff] }
 0x192   : > { %1612 = vmatmul.f32.gmra.mxu3 %v2328_v63 }
 0x193   : > { %v687_v51 = vpop.f32.mrf.mxu2  ;;  %v1077_v25 = vpop.f32.mrf.mxu0 }
 0x194   : > { %v749_v32 = vadd.f32 %v687_v51, %v526_v21  ;;  %v2363_v51 = vld [vmem:[#allocation2 + $0x62] sm:$0xff] }
 0x195   : > { %v528_v22 = vpop.f32.mrf.mxu1  ;;  %v883_v24 = vpop.f32.mrf.mxu3 }
 0x196   : > { %v945_v42 = vadd.f32 %v883_v24, %v749_v32  ;;  %1806 = vmatmul.f32.gmra.mxu0 %v2360_v46  ;;  %v529_v50 = vadd.f32 %v528_v22, %v2858_v5  ;;  %v2300_v22 = vld [vmem:[#allocation2 + $0x68] sm:$0xff] }
 0x198   : > { %v2968_v31 = vadd.f32 %v1077_v25, %v945_v42  ;;  %1225 = vmatmul.f32.gmra.mxu1 %v2359_v19  ;;  %1421 = vmatmul.f32.gmra.mxu2 %v2297_v16  ;;  %v2332_v16 = vld [vmem:[#allocation2 + $0x69] sm:$0xff] }
 0x19a   : > { %1615 = vmatmul.f32.gmra.mxu3 %v2329_v28 }
 0x19b   : > { %v690_v33 = vpop.f32.mrf.mxu2  ;;  %v1080_v60 = vpop.f32.mrf.mxu0 }
 0x19c   : > { %v750_v59 = vadd.f32 %v690_v33, %v529_v50  ;;  %v2364_v33 = vld [vmem:[#allocation2 + $0x6a] sm:$0xff] }
 0x19d   : > { %v531_v49 = vpop.f32.mrf.mxu1  ;;  %v886_v41 = vpop.f32.mrf.mxu3 }
 0x19e   : > { %v946_v48 = vadd.f32 %v886_v41, %v750_v59  ;;  %1809 = vmatmul.f32.gmra.mxu0 %v2361_v8  ;;  %v532_v2 = vadd.f32 %v531_v49, %v2867_v13  ;;  %v2301_v49 = vld [vmem:[#allocation2 + $0x78] sm:$0xff] }
 0x1a0   : > { %v2971_v53 = vadd.f32 %v1080_v60, %v946_v48  ;;  %1228 = vmatmul.f32.gmra.mxu1 %v2360_v46  ;;  %1424 = vmatmul.f32.gmra.mxu2 %v2298_v43  ;;  %v2333_v43 = vld [vmem:[#allocation2 + $0x79] sm:$0xff] }
 0x1a2   : > { %1618 = vmatmul.f32.gmra.mxu3 %v2330_v15 }
 0x1a3   : > { %v693_v44 = vpop.f32.mrf.mxu2  ;;  %v1083_v5 = vpop.f32.mrf.mxu0 }
 0x1a4   : > { %v751_v19 = vadd.f32 %v693_v44, %v532_v2  ;;  %v2365_v44 = vld [vmem:[#allocation2 + $0x7a] sm:$0xff] }
 0x1a5   : > { %v534_v23 = vpop.f32.mrf.mxu1  ;;  %v889_v4 = vpop.f32.mrf.mxu3 }
 0x1a6   : > { %v947_v30 = vadd.f32 %v889_v4, %v751_v19  ;;  %1812 = vmatmul.f32.gmra.mxu0 %v2362_v35  ;;  %v535_v63 = vadd.f32 %v534_v23, %v2876_v10  ;;  %v2302_v23 = vld [vmem:[#allocation2 + $0x80] sm:$0xff] }
 0x1a8   : > { %v2974_v12 = vadd.f32 %v1083_v5, %v947_v30  ;;  %1231 = vmatmul.f32.gmra.mxu1 %v2361_v8  ;;  %1427 = vmatmul.f32.gmra.mxu2 %v2299_v47  ;;  %v2334_v47 = vld [vmem:[#allocation2 + $0x81] sm:$0xff] }
 0x1aa   : > { %1621 = vmatmul.f32.gmra.mxu3 %v2331_v62 }
 0x1ab   : > { %v696_v21 = vpop.f32.mrf.mxu2  ;;  %v1086_v13 = vpop.f32.mrf.mxu0 }
 0x1ac   : > { %v752_v25 = vadd.f32 %v696_v21, %v535_v63  ;;  %v2366_v21 = vld [vmem:[#allocation2 + $0x82] sm:$0xff] }
 0x1ad   : > { %v537_v46 = vpop.f32.mrf.mxu1  ;;  %v892_v32 = vpop.f32.mrf.mxu3 }
 0x1ae   : > { %v948_v24 = vadd.f32 %v892_v32, %v752_v25  ;;  %1815 = vmatmul.f32.gmra.mxu0 %v2363_v51  ;;  %v538_v28 = vadd.f32 %v537_v46, %v2885_v29  ;;  %v2303_v46 = vld [vmem:[#allocation2 + $0x90] sm:$0xff] }
 0x1b0   : > { %v2977_v42 = vadd.f32 %v1086_v13, %v948_v24  ;;  %1234 = vmatmul.f32.gmra.mxu1 %v2362_v35  ;;  %1430 = vmatmul.f32.gmra.mxu2 %v2300_v22  ;;  %v2335_v22 = vld [vmem:[#allocation2 + $0x91] sm:$0xff] }
 0x1b2   : > { %1624 = vmatmul.f32.gmra.mxu3 %v2332_v16 }
 0x1b3   : > { %v699_v50 = vpop.f32.mrf.mxu2  ;;  %v1089_v10 = vpop.f32.mrf.mxu0 }
 0x1b4   : > { %v753_v60 = vadd.f32 %v699_v50, %v538_v28  ;;  %v2367_v50 = vld [vmem:[#allocation2 + $0x92] sm:$0xff] }
 0x1b5   : > { %v540_v8 = vpop.f32.mrf.mxu1  ;;  %v895_v59 = vpop.f32.mrf.mxu3 }
 0x1b6   : > { %v949_v41 = vadd.f32 %v895_v59, %v753_v60  ;;  %1818 = vmatmul.f32.gmra.mxu0 %v2364_v33  ;;  %v541_v15 = vadd.f32 %v540_v8, %v2894_v40  ;;  %v2304_v8 = vld [vmem:[#allocation2 + $0x98] sm:$0xff] }
 0x1b8   : > { %v2980_v48 = vadd.f32 %v1089_v10, %v949_v41  ;;  %1237 = vmatmul.f32.gmra.mxu1 %v2363_v51  ;;  %1433 = vmatmul.f32.gmra.mxu2 %v2301_v49  ;;  %v2336_v49 = vld [vmem:[#allocation2 + $0x99] sm:$0xff] }
 0x1ba   : > { %1627 = vmatmul.f32.gmra.mxu3 %v2333_v43 }
 0x1bb   : > { %v702_v2 = vpop.f32.mrf.mxu2  ;;  %v1092_v29 = vpop.f32.mrf.mxu0 }
 0x1bc   : > { %v754_v5 = vadd.f32 %v702_v2, %v541_v15  ;;  %v2368_v2 = vld [vmem:[#allocation2 + $0x9a] sm:$0xff] }
 0x1bd   : > { %v543_v35 = vpop.f32.mrf.mxu1  ;;  %v898_v19 = vpop.f32.mrf.mxu3 }
 0x1be   : > { %v950_v4 = vadd.f32 %v898_v19, %v754_v5  ;;  %1821 = vmatmul.f32.gmra.mxu0 %v2365_v44  ;;  %v544_v62 = vadd.f32 %v543_v35, %v2903_v55  ;;  %v2305_v35 = vld [vmem:[#allocation2 + $0xa8] sm:$0xff] }
 0x1c0   : > { %v2983_v30 = vadd.f32 %v1092_v29, %v950_v4  ;;  %1240 = vmatmul.f32.gmra.mxu1 %v2364_v33  ;;  %1436 = vmatmul.f32.gmra.mxu2 %v2302_v23  ;;  %v2337_v23 = vld [vmem:[#allocation2 + $0xa9] sm:$0xff] }
 0x1c2   : > { %1630 = vmatmul.f32.gmra.mxu3 %v2334_v47 }
 0x1c3   : > { %v705_v63 = vpop.f32.mrf.mxu2  ;;  %v1095_v40 = vpop.f32.mrf.mxu0 }
 0x1c4   : > { %v755_v13 = vadd.f32 %v705_v63, %v544_v62  ;;  %v2369_v63 = vld [vmem:[#allocation2 + $0xaa] sm:$0xff] }
 0x1c5   : > { %v546_v51 = vpop.f32.mrf.mxu1  ;;  %v901_v25 = vpop.f32.mrf.mxu3 }
 0x1c6   : > { %v951_v32 = vadd.f32 %v901_v25, %v755_v13  ;;  %1824 = vmatmul.f32.gmra.mxu0 %v2366_v21  ;;  %v547_v16 = vadd.f32 %v546_v51, %v2846_v54  ;;  %v2306_v51 = vld [vmem:[#allocation2 + $0xb0] sm:$0xff] }
 0x1c8   : > { %v2986_v24 = vadd.f32 %v1095_v40, %v951_v32  ;;  %1243 = vmatmul.f32.gmra.mxu1 %v2365_v44  ;;  %1439 = vmatmul.f32.gmra.mxu2 %v2303_v46  ;;  %v2338_v46 = vld [vmem:[#allocation2 + $0xb1] sm:$0xff] }
 0x1ca   : > { %1633 = vmatmul.f32.gmra.mxu3 %v2335_v22 }
 0x1cb   : > { %v708_v28 = vpop.f32.mrf.mxu2  ;;  %v1098_v55 = vpop.f32.mrf.mxu0 }
 0x1cc   : > { %v756_v10 = vadd.f32 %v708_v28, %v547_v16  ;;  %v2370_v28 = vld [vmem:[#allocation2 + $0xb2] sm:$0xff] }
 0x1cd   : > { %v549_v33 = vpop.f32.mrf.mxu1  ;;  %v904_v60 = vpop.f32.mrf.mxu3 }
 0x1ce   : > { %v952_v59 = vadd.f32 %v904_v60, %v756_v10  ;;  %1827 = vmatmul.f32.gmra.mxu0 %v2367_v50  ;;  %v550_v43 = vadd.f32 %v549_v33, %v2855_v1  ;;  %v2307_v33 = vld [vmem:[#allocation2 + $0xc0] sm:$0xff] }
 0x1d0   : > { %v2989_v41 = vadd.f32 %v1098_v55, %v952_v59  ;;  %1246 = vmatmul.f32.gmra.mxu1 %v2366_v21  ;;  %1442 = vmatmul.f32.gmra.mxu2 %v2304_v8  ;;  %v2339_v8 = vld [vmem:[#allocation2 + $0xc1] sm:$0xff] }
 0x1d2   : > { %1636 = vmatmul.f32.gmra.mxu3 %v2336_v49 }
 0x1d3   : > { %v711_v15 = vpop.f32.mrf.mxu2  ;;  %v1101_v54 = vpop.f32.mrf.mxu0 }
 0x1d4   : > { %v757_v29 = vadd.f32 %v711_v15, %v550_v43  ;;  %v2371_v15 = vld [vmem:[#allocation2 + $0xc2] sm:$0xff] }
 0x1d5   : > { %v552_v44 = vpop.f32.mrf.mxu1  ;;  %v907_v5 = vpop.f32.mrf.mxu3 }
 0x1d6   : > { %v953_v19 = vadd.f32 %v907_v5, %v757_v29  ;;  %1830 = vmatmul.f32.gmra.mxu0 %v2368_v2  ;;  %v553_v47 = vadd.f32 %v552_v44, %v2864_v9  ;;  %v2308_v44 = vld [vmem:[#allocation2 + $0xc8] sm:$0xff] }
 0x1d8   : > { %v2992_v4 = vadd.f32 %v1101_v54, %v953_v19  ;;  %1249 = vmatmul.f32.gmra.mxu1 %v2367_v50  ;;  %1445 = vmatmul.f32.gmra.mxu2 %v2305_v35  ;;  %v2340_v35 = vld [vmem:[#allocation2 + $0xc9] sm:$0xff] }
 0x1da   : > { %1639 = vmatmul.f32.gmra.mxu3 %v2337_v23 }
 0x1db   : > { %v714_v62 = vpop.f32.mrf.mxu2  ;;  %v1104_v1 = vpop.f32.mrf.mxu0 }
 0x1dc   : > { %v758_v40 = vadd.f32 %v714_v62, %v553_v47  ;;  %v2372_v62 = vld [vmem:[#allocation2 + $0xca] sm:$0xff] }
 0x1dd   : > { %v555_v21 = vpop.f32.mrf.mxu1  ;;  %v910_v13 = vpop.f32.mrf.mxu3 }
 0x1de   : > { %v954_v25 = vadd.f32 %v910_v13, %v758_v40  ;;  %1833 = vmatmul.f32.gmra.mxu0 %v2369_v63  ;;  %v556_v22 = vadd.f32 %v555_v21, %v2873_v20  ;;  %v2309_v21 = vld [vmem:[#allocation2 + $0xd8] sm:$0xff] }
 0x1e0   : > { %v2995_v32 = vadd.f32 %v1104_v1, %v954_v25  ;;  %1252 = vmatmul.f32.gmra.mxu1 %v2368_v2  ;;  %1448 = vmatmul.f32.gmra.mxu2 %v2306_v51  ;;  %v2341_v51 = vld [vmem:[#allocation2 + $0xd9] sm:$0xff] }
 0x1e2   : > { %1642 = vmatmul.f32.gmra.mxu3 %v2338_v46 }
 0x1e3   : > { %v717_v16 = vpop.f32.mrf.mxu2  ;;  %v1107_v9 = vpop.f32.mrf.mxu0 }
 0x1e4   : > { %v759_v55 = vadd.f32 %v717_v16, %v556_v22  ;;  %v2373_v16 = vld [vmem:[#allocation2 + $0xda] sm:$0xff] }
 0x1e5   : > { %v558_v50 = vpop.f32.mrf.mxu1  ;;  %v913_v10 = vpop.f32.mrf.mxu3 }
 0x1e6   : > { %v955_v60 = vadd.f32 %v913_v10, %v759_v55  ;;  %1836 = vmatmul.f32.gmra.mxu0 %v2370_v28  ;;  %v559_v49 = vadd.f32 %v558_v50, %v2882_v26  ;;  %v2310_v50 = vld [vmem:[#allocation2 + $0xe0] sm:$0xff] }
 0x1e8   : > { %v2998_v59 = vadd.f32 %v1107_v9, %v955_v60  ;;  %1255 = vmatmul.f32.gmra.mxu1 %v2369_v63  ;;  %1451 = vmatmul.f32.gmra.mxu2 %v2307_v33  ;;  %v2342_v33 = vld [vmem:[#allocation2 + $0xe1] sm:$0xff] }
 0x1ea   : > { %1645 = vmatmul.f32.gmra.mxu3 %v2339_v8 }
 0x1eb   : > { %v720_v43 = vpop.f32.mrf.mxu2  ;;  %v1110_v20 = vpop.f32.mrf.mxu0 }
 0x1ec   : > { %v760_v54 = vadd.f32 %v720_v43, %v559_v49  ;;  %v2374_v43 = vld [vmem:[#allocation2 + $0xe2] sm:$0xff] }
 0x1ed   : > { %v561_v2 = vpop.f32.mrf.mxu1  ;;  %v916_v29 = vpop.f32.mrf.mxu3 }
 0x1ee   : > { %v956_v5 = vadd.f32 %v916_v29, %v760_v54  ;;  %1839 = vmatmul.f32.gmra.mxu0 %v2371_v15  ;;  %v562_v23 = vadd.f32 %v561_v2, %v2891_v36  ;;  %v2311_v2 = vld [vmem:[#allocation2 + $0xf0] sm:$0xff] }
 0x1f0   : > { %v3001_v19 = vadd.f32 %v1110_v20, %v956_v5  ;;  %1258 = vmatmul.f32.gmra.mxu1 %v2370_v28  ;;  %1454 = vmatmul.f32.gmra.mxu2 %v2308_v44  ;;  %v2343_v44 = vld [vmem:[#allocation2 + $0xf1] sm:$0xff] }
 0x1f2   : > { %1648 = vmatmul.f32.gmra.mxu3 %v2340_v35 }
 0x1f3   : > { %v723_v47 = vpop.f32.mrf.mxu2  ;;  %v1113_v26 = vpop.f32.mrf.mxu0 }
 0x1f4   : > { %v761_v1 = vadd.f32 %v723_v47, %v562_v23  ;;  %v2375_v47 = vld [vmem:[#allocation2 + $0xf2] sm:$0xff] }
 0x1f5   : > { %v564_v63 = vpop.f32.mrf.mxu1  ;;  %v919_v40 = vpop.f32.mrf.mxu3 }
 0x1f6   : > { %v957_v13 = vadd.f32 %v919_v40, %v761_v1  ;;  %1842 = vmatmul.f32.gmra.mxu0 %v2372_v62  ;;  %v565_v46 = vadd.f32 %v564_v63, %v2900_v45  ;;  %v2312_v63 = vld [vmem:[#allocation2 + $0xf8] sm:$0xff] }
 0x1f8   : > { %v3004_v25 = vadd.f32 %v1113_v26, %v957_v13  ;;  %1261 = vmatmul.f32.gmra.mxu1 %v2371_v15  ;;  %1457 = vmatmul.f32.gmra.mxu2 %v2309_v21  ;;  %v3016_v21 = vld [vmem:[%s3191_s2] ss:$0 sm:$0xff] }
 0x1f9   : > { %v2344_v13 = vld [vmem:[#allocation2 + $0xf9] sm:$0xff] }
 0x1fa   : > { %1651 = vmatmul.f32.gmra.mxu3 %v2341_v51 }
 0x1fb   : > { %v726_v22 = vpop.f32.mrf.mxu2  ;;  %v1116_v36 = vpop.f32.mrf.mxu0 }
 0x1fc   : > { %v762_v9 = vadd.f32 %v726_v22, %v565_v46 }
 0x1fd   : > { %v567_v28 = vpop.f32.mrf.mxu1  ;;  %v922_v55 = vpop.f32.mrf.mxu3 }
 0x1fe   : > { %v958_v10 = vadd.f32 %v922_v55, %v762_v9  ;;  %1845 = vmatmul.f32.gmra.mxu0 %v2373_v16  ;;  %v568_v8 = vadd.f32 %v567_v28, %v2907_v56  ;;  %v2376_v9 = vld [vmem:[#allocation2 + $0xfa] sm:$0xff] }
 0x200   : > { %v3007_v60 = vadd.f32 %v1116_v36, %v958_v10  ;;  %1264 = vmatmul.f32.gmra.mxu1 %v2372_v62  ;;  %1460 = vmatmul.f32.gmra.mxu2 %v2310_v50 }
 0x202   : > { %1654 = vmatmul.f32.gmra.mxu3 %v2342_v33  ;;  %v2313_v33 = vld [vmem:[#allocation2 + $0x108] sm:$0xff] }
 0x203   : > { %v729_v49 = vpop.f32.mrf.mxu2  ;;  %v1119_v45 = vpop.f32.mrf.mxu0 }
 0x204   : > { %v763_v20 = vadd.f32 %v729_v49, %v568_v8 }
 0x205   : > { %v925_v15 = vpop.f32.mrf.mxu3  ;;  %v1220_v54 = vpop.f32.mrf.mxu1 }
 0x206   : > { %v959_v29 = vadd.f32 %v925_v15, %v763_v20  ;;  %1848 = vmatmul.f32.gmra.mxu0 %v2374_v43  ;;  %v1316_v35 = vadd.f32 %v1220_v54, %v2912_v27  ;;  %v3021_v27 = vld [vmem:[%s3192_s3] ss:$0 sm:$0xff] }
 0x208   : > { %v3010_v5 = vadd.f32 %v1119_v45, %v959_v29  ;;  %1267 = vmatmul.f32.gmra.mxu1 %v2373_v16  ;;  %1463 = vmatmul.f32.gmra.mxu2 %v2311_v2  ;;  %v2345_v45 = vld [vmem:[#allocation2 + $0x109] sm:$0xff] }
 0x209   : > { %v2377_v2 = vld [vmem:[#allocation2 + $0x10a] sm:$0xff] }
 0x20a   : > { %1657 = vmatmul.f32.gmra.mxu3 %v2343_v44 }
 0x20b   : > { %v1416_v23 = vpop.f32.mrf.mxu2  ;;  %v1804_v56 = vpop.f32.mrf.mxu0 }
 0x20c   : > { %v1512_v26 = vadd.f32 %v1416_v23, %v1316_v35 }
 0x20d   : > { %v1223_v62 = vpop.f32.mrf.mxu1  ;;  %v1610_v1 = vpop.f32.mrf.mxu3 }
 0x20e   : > { %v1706_v40 = vadd.f32 %v1610_v1, %v1512_v26  ;;  %1851 = vmatmul.f32.gmra.mxu0 %v2375_v47  ;;  %v1317_v46 = vadd.f32 %v1223_v62, %v2916_v52 }
 0x210   : > { %v1900_v51 = vadd.f32 %v1804_v56, %v1706_v40  ;;  %1270 = vmatmul.f32.gmra.mxu1 %v2374_v43  ;;  %1466 = vmatmul.f32.gmra.mxu2 %v2312_v63  ;;  %v2314_v56 = vld [vmem:[#allocation2 + $0x110] sm:$0xff] }
 0x212   : > { %v1936_v22 = vmul.f32 %v3016_v21, %v1900_v51  ;;  %1660 = vmatmul.f32.gmra.mxu3 %v2344_v13  ;;  %v2378_v51 = vld [vmem:[#allocation2 + $0x112] sm:$0xff] }
 0x213   : > { %v1419_v36 = vpop.f32.mrf.mxu2  ;;  %v1807_v16 = vpop.f32.mrf.mxu0 }
 0x214   : > { %v1972_v28 = vadd.f32 %v3021_v27, %v1936_v22  ;;  %v1513_v55 = vadd.f32 %v1419_v36, %v1317_v46 }
 0x215   : > { %v1226_v50 = vpop.f32.mrf.mxu1  ;;  %v1613_v10 = vpop.f32.mrf.mxu3 }
 0x216   : > { %v2004_v8 = vmax.f32 %v1972_v28, 0.0  ;;  %v1707_v49 = vadd.f32 %v1613_v10, %v1513_v55  ;;  %1854 = vmatmul.f32.gmra.mxu0 %v2376_v9  ;;  %v1318_v52 = vadd.f32 %v1226_v50, %v2920_v58  ;;  %v2315_v28 = vld [vmem:[#allocation2 + $0x120] sm:$0xff] }
 0x218   : > { %2036 = vst [vmem:[%s2762_s11] sm:$0xff] %v2004_v8  ;;  %v1901_v43 = vadd.f32 %v1807_v16, %v1707_v49  ;;  %1273 = vmatmul.f32.gmra.mxu1 %v2375_v47  ;;  %1469 = vmatmul.f32.gmra.mxu2 %v2313_v33  ;;  %v2346_v47 = vld [vmem:[#allocation2 + $0x111] sm:$0xff] }
 0x21a   : > { %v1937_v20 = vmul.f32 %v3016_v21, %v1901_v43  ;;  %1663 = vmatmul.f32.gmra.mxu3 %v2345_v45  ;;  %v2379_v45 = vld [vmem:[#allocation2 + $0x122] sm:$0xff] }
 0x21b   : > { %v1422_v15 = vpop.f32.mrf.mxu2  ;;  %v1810_v54 = vpop.f32.mrf.mxu0 }
 0x21c   : > { %v1973_v29 = vadd.f32 %v3021_v27, %v1937_v20  ;;  %v1514_v44 = vadd.f32 %v1422_v15, %v1318_v52 }
 0x21d   : > { %v1229_v35 = vpop.f32.mrf.mxu1  ;;  %v1616_v23 = vpop.f32.mrf.mxu3 }
 0x21e   : > { %v2005_v26 = vmax.f32 %v1973_v29, 0.0  ;;  %v1708_v62 = vadd.f32 %v1616_v23, %v1514_v44  ;;  %1857 = vmatmul.f32.gmra.mxu0 %v2377_v2  ;;  %v1319_v58 = vadd.f32 %v1229_v35, %v2924_v38 }
 0x220   : > { %2037 = vst [vmem:[%s2762_s11 + $0x8] sm:$0xff] %v2005_v26  ;;  %v1902_v1 = vadd.f32 %v1810_v54, %v1708_v62  ;;  %1276 = vmatmul.f32.gmra.mxu1 %v2376_v9  ;;  %1472 = vmatmul.f32.gmra.mxu2 %v2314_v56  ;;  %v2347_v9 = vld [vmem:[#allocation2 + $0x121] sm:$0xff]  ;;  %v2380_v62 = vld [vmem:[#allocation2 + $0x12a] sm:$0xff] }
 0x221   : > { %v2316_v54 = vld [vmem:[#allocation2 + $0x128] sm:$0xff] }
 0x222   : > { %v1938_v63 = vmul.f32 %v3016_v21, %v1902_v1  ;;  %1666 = vmatmul.f32.gmra.mxu3 %v2346_v47 }
 0x223   : > { %v1425_v40 = vpop.f32.mrf.mxu2  ;;  %v1813_v13 = vpop.f32.mrf.mxu0 }
 0x224   : > { %v1974_v46 = vadd.f32 %v3021_v27, %v1938_v63  ;;  %v1515_v22 = vadd.f32 %v1425_v40, %v1319_v58  ;;  %v2317_v40 = vld [vmem:[#allocation2 + $0x138] sm:$0xff] }
 0x225   : > { %v1232_v36 = vpop.f32.mrf.mxu1  ;;  %v1619_v16 = vpop.f32.mrf.mxu3 }
 0x226   : > { %v2006_v55 = vmax.f32 %v1974_v46, 0.0  ;;  %v1709_v50 = vadd.f32 %v1619_v16, %v1515_v22  ;;  %1860 = vmatmul.f32.gmra.mxu0 %v2378_v51  ;;  %v1320_v38 = vadd.f32 %v1232_v36, %v2928_v17 }
 0x228   : > { %2038 = vst [vmem:[%s2762_s11 + $0x10] sm:$0xff] %v2006_v55  ;;  %v1903_v10 = vadd.f32 %v1813_v13, %v1709_v50  ;;  %1279 = vmatmul.f32.gmra.mxu1 %v2377_v2  ;;  %1475 = vmatmul.f32.gmra.mxu2 %v2315_v28  ;;  %v2348_v2 = vld [vmem:[#allocation2 + $0x129] sm:$0xff]  ;;  %v2381_v55 = vld [vmem:[#allocation2 + $0x13a] sm:$0xff] }
 0x22a   : > { %v1939_v33 = vmul.f32 %v3016_v21, %v1903_v10  ;;  %1669 = vmatmul.f32.gmra.mxu3 %v2347_v9 }
 0x22b   : > { %v1428_v8 = vpop.f32.mrf.mxu2  ;;  %v1816_v49 = vpop.f32.mrf.mxu0 }
 0x22c   : > { %v1975_v43 = vadd.f32 %v3021_v27, %v1939_v33  ;;  %v1516_v52 = vadd.f32 %v1428_v8, %v1320_v38  ;;  %v2318_v33 = vld [vmem:[#allocation2 + $0x140] sm:$0xff] }
 0x22d   : > { %v1235_v20 = vpop.f32.mrf.mxu1  ;;  %v1622_v15 = vpop.f32.mrf.mxu3 }
 0x22e   : > { %v2007_v29 = vmax.f32 %v1975_v43, 0.0  ;;  %v1710_v44 = vadd.f32 %v1622_v15, %v1516_v52  ;;  %1863 = vmatmul.f32.gmra.mxu0 %v2379_v45  ;;  %v1321_v17 = vadd.f32 %v1235_v20, %v2932_v14 }
 0x230   : > { %2039 = vst [vmem:[%s2762_s11 + $0x18] sm:$0xff] %v2007_v29  ;;  %v1904_v35 = vadd.f32 %v1816_v49, %v1710_v44  ;;  %1282 = vmatmul.f32.gmra.mxu1 %v2378_v51  ;;  %1478 = vmatmul.f32.gmra.mxu2 %v2316_v54  ;;  %v2349_v51 = vld [vmem:[#allocation2 + $0x139] sm:$0xff]  ;;  %v2382_v54 = vld [vmem:[#allocation2 + $0x142] sm:$0xff] }
 0x232   : > { %v1940_v23 = vmul.f32 %v3016_v21, %v1904_v35  ;;  %1672 = vmatmul.f32.gmra.mxu3 %v2348_v2 }
 0x233   : > { %v1431_v56 = vpop.f32.mrf.mxu2  ;;  %v1819_v26 = vpop.f32.mrf.mxu0 }
 0x234   : > { %v1976_v47 = vadd.f32 %v3021_v27, %v1940_v23  ;;  %v1517_v1 = vadd.f32 %v1431_v56, %v1321_v17  ;;  %v2319_v17 = vld [vmem:[#allocation2 + $0x150] sm:$0xff] }
 0x235   : > { %v1238_v58 = vpop.f32.mrf.mxu1  ;;  %v1625_v63 = vpop.f32.mrf.mxu3 }
 0x236   : > { %v2008_v13 = vmax.f32 %v1976_v47, 0.0  ;;  %v1711_v46 = vadd.f32 %v1625_v63, %v1517_v1  ;;  %1866 = vmatmul.f32.gmra.mxu0 %v2380_v62  ;;  %v1322_v14 = vadd.f32 %v1238_v58, %v2935_v39  ;;  %v2383_v63 = vld [vmem:[#allocation2 + $0x152] sm:$0xff] }
 0x238   : > { %2040 = vst [vmem:[%s2762_s11 + $0x20] sm:$0xff] %v2008_v13  ;;  %v1905_v22 = vadd.f32 %v1819_v26, %v1711_v46  ;;  %1285 = vmatmul.f32.gmra.mxu1 %v2379_v45  ;;  %1481 = vmatmul.f32.gmra.mxu2 %v2317_v40  ;;  %v2350_v45 = vld [vmem:[#allocation2 + $0x141] sm:$0xff]  ;;  %v2351_v26 = vld [vmem:[#allocation2 + $0x151] sm:$0xff] }
 0x23a   : > { %v1941_v36 = vmul.f32 %v3016_v21, %v1905_v22  ;;  %1675 = vmatmul.f32.gmra.mxu3 %v2349_v51  ;;  %v2320_v22 = vld [vmem:[#allocation2 + $0x158] sm:$0xff] }
 0x23b   : > { %v1434_v16 = vpop.f32.mrf.mxu2  ;;  %v1822_v28 = vpop.f32.mrf.mxu0 }
 0x23c   : > { %v1977_v50 = vadd.f32 %v3021_v27, %v1941_v36  ;;  %v1518_v9 = vadd.f32 %v1434_v16, %v1322_v14  ;;  %v2352_v16 = vld [vmem:[#allocation2 + $0x159] sm:$0xff] }
 0x23d   : > { %v1241_v10 = vpop.f32.mrf.mxu1  ;;  %v1628_v38 = vpop.f32.mrf.mxu3 }
 0x23e   : > { %v2009_v8 = vmax.f32 %v1977_v50, 0.0  ;;  %v1712_v49 = vadd.f32 %v1628_v38, %v1518_v9  ;;  %1869 = vmatmul.f32.gmra.mxu0 %v2381_v55  ;;  %v1323_v39 = vadd.f32 %v1241_v10, %v2938_v11  ;;  %v2384_v10 = vld [vmem:[#allocation2 + $0x15a] sm:$0xff] }
 0x240   : > { %2041 = vst [vmem:[%s2762_s11 + $0x28] sm:$0xff] %v2009_v8  ;;  %v1906_v43 = vadd.f32 %v1822_v28, %v1712_v49  ;;  %1288 = vmatmul.f32.gmra.mxu1 %v2380_v62  ;;  %1484 = vmatmul.f32.gmra.mxu2 %v2318_v33 }
 0x242   : > { %v1942_v52 = vmul.f32 %v3016_v21, %v1906_v43  ;;  %1678 = vmatmul.f32.gmra.mxu3 %v2350_v45  ;;  %v2321_v45 = vld [vmem:[#allocation2 + $0x168] sm:$0xff] }
 0x243   : > { %v1437_v20 = vpop.f32.mrf.mxu2  ;;  %v1825_v15 = vpop.f32.mrf.mxu0 }
 0x244   : > { %v1978_v29 = vadd.f32 %v3021_v27, %v1942_v52  ;;  %v1519_v44 = vadd.f32 %v1437_v20, %v1323_v39  ;;  %v2353_v52 = vld [vmem:[#allocation2 + $0x169] sm:$0xff] }
 0x245   : > { %v1244_v2 = vpop.f32.mrf.mxu1  ;;  %v1631_v35 = vpop.f32.mrf.mxu3 }
 0x246   : > { %v2010_v23 = vmax.f32 %v1978_v29, 0.0  ;;  %v1713_v56 = vadd.f32 %v1631_v35, %v1519_v44  ;;  %1872 = vmatmul.f32.gmra.mxu0 %v2382_v54  ;;  %v1324_v11 = vadd.f32 %v1244_v2, %v2941_v34  ;;  %v2385_v44 = vld [vmem:[#allocation2 + $0x16a] sm:$0xff] }
 0x248   : > { %2042 = vst [vmem:[%s2762_s11 + $0x30] sm:$0xff] %v2010_v23  ;;  %v1907_v62 = vadd.f32 %v1825_v15, %v1713_v56  ;;  %1291 = vmatmul.f32.gmra.mxu1 %v2381_v55  ;;  %1487 = vmatmul.f32.gmra.mxu2 %v2319_v17  ;;  %v2322_v56 = vld [vmem:[#allocation2 + $0x170] sm:$0xff] }
 0x24a   : > { %v1943_v47 = vmul.f32 %v3016_v21, %v1907_v62  ;;  %1681 = vmatmul.f32.gmra.mxu3 %v2351_v26 }
 0x24b   : > { %v1440_v1 = vpop.f32.mrf.mxu2  ;;  %v1828_v58 = vpop.f32.mrf.mxu0 }
 0x24c   : > { %v1979_v40 = vadd.f32 %v3021_v27, %v1943_v47  ;;  %v1520_v13 = vadd.f32 %v1440_v1, %v1324_v11  ;;  %v2354_v11 = vld [vmem:[#allocation2 + $0x171] sm:$0xff] }
 0x24d   : > { %v1247_v46 = vpop.f32.mrf.mxu1  ;;  %v1634_v51 = vpop.f32.mrf.mxu3 }
 0x24e   : > { %v2011_v14 = vmax.f32 %v1979_v40, 0.0  ;;  %v1714_v36 = vadd.f32 %v1634_v51, %v1520_v13  ;;  %1875 = vmatmul.f32.gmra.mxu0 %v2383_v63  ;;  %v1325_v34 = vadd.f32 %v1247_v46, %v2944_v61  ;;  %v2386_v40 = vld [vmem:[#allocation2 + $0x172] sm:$0xff] }
 0x250   : > { %2043 = vst [vmem:[%s2762_s11 + $0x38] sm:$0xff] %v2011_v14  ;;  %v1908_v28 = vadd.f32 %v1828_v58, %v1714_v36  ;;  %1294 = vmatmul.f32.gmra.mxu1 %v2382_v54  ;;  %1490 = vmatmul.f32.gmra.mxu2 %v2320_v22  ;;  %v2323_v14 = vld [vmem:[#allocation2 + $0x180] sm:$0xff] }
 0x252   : > { %v1944_v55 = vmul.f32 %v3016_v21, %v1908_v28  ;;  %1684 = vmatmul.f32.gmra.mxu3 %v2352_v16  ;;  %v2355_v28 = vld [vmem:[#allocation2 + $0x181] sm:$0xff] }
 0x253   : > { %v1443_v50 = vpop.f32.mrf.mxu2  ;;  %v1831_v9 = vpop.f32.mrf.mxu0 }
 0x254   : > { %v1980_v38 = vadd.f32 %v3021_v27, %v1944_v55  ;;  %v1521_v33 = vadd.f32 %v1443_v50, %v1325_v34 }
 0x255   : > { %v1250_v8 = vpop.f32.mrf.mxu1  ;;  %v1637_v49 = vpop.f32.mrf.mxu3 }
 0x256   : > { %v2012_v43 = vmax.f32 %v1980_v38, 0.0  ;;  %v1715_v39 = vadd.f32 %v1637_v49, %v1521_v33  ;;  %1878 = vmatmul.f32.gmra.mxu0 %v2384_v10  ;;  %v1326_v61 = vadd.f32 %v1250_v8, %v2947_v6 }
 0x258   : > { %2044 = vst [vmem:[%s2762_s11 + $0x40] sm:$0xff] %v2012_v43  ;;  %v1909_v20 = vadd.f32 %v1831_v9, %v1715_v39  ;;  %1297 = vmatmul.f32.gmra.mxu1 %v2383_v63  ;;  %1493 = vmatmul.f32.gmra.mxu2 %v2321_v45  ;;  %v2324_v45 = vld [vmem:[#allocation2 + $0x188] sm:$0xff] }
 0x25a   : > { %v1945_v15 = vmul.f32 %v3016_v21, %v1909_v20  ;;  %1687 = vmatmul.f32.gmra.mxu3 %v2353_v52  ;;  %v2356_v52 = vld [vmem:[#allocation2 + $0x189] sm:$0xff] }
 0x25b   : > { %v1446_v54 = vpop.f32.mrf.mxu2  ;;  %v1834_v29 = vpop.f32.mrf.mxu0 }
 0x25c   : > { %v1981_v2 = vadd.f32 %v3021_v27, %v1945_v15  ;;  %v1522_v35 = vadd.f32 %v1446_v54, %v1326_v61 }
 0x25d   : > { %v1253_v17 = vpop.f32.mrf.mxu1  ;;  %v1640_v23 = vpop.f32.mrf.mxu3 }
 0x25e   : > { %v2013_v26 = vmax.f32 %v1981_v2, 0.0  ;;  %v1716_v62 = vadd.f32 %v1640_v23, %v1522_v35  ;;  %1881 = vmatmul.f32.gmra.mxu0 %v2385_v44  ;;  %v1327_v6 = vadd.f32 %v1253_v17, %v2950_v18  ;;  %v2325_v23 = vld [vmem:[#allocation2 + $0x198] sm:$0xff] }
 0x260   : > { %2045 = vst [vmem:[%s2762_s11 + $0x48] sm:$0xff] %v2013_v26  ;;  %v1910_v47 = vadd.f32 %v1834_v29, %v1716_v62  ;;  %1300 = vmatmul.f32.gmra.mxu1 %v2384_v10  ;;  %1496 = vmatmul.f32.gmra.mxu2 %v2322_v56  ;;  %v2387_v10 = vld [vmem:[#allocation2 + $0x182] sm:$0xff]  ;;  %v2388_v29 = vld [vmem:[#allocation2 + $0x18a] sm:$0xff]  ;;  %v2357_v62 = vld [vmem:[#allocation2 + $0x199] sm:$0xff] }
 0x262   : > { %v1946_v1 = vmul.f32 %v3016_v21, %v1910_v47  ;;  %1690 = vmatmul.f32.gmra.mxu3 %v2354_v11 }
 0x263   : > { %v1449_v58 = vpop.f32.mrf.mxu2  ;;  %v1837_v63 = vpop.f32.mrf.mxu0 }
 0x264   : > { %v1982_v13 = vadd.f32 %v3021_v27, %v1946_v1  ;;  %v1523_v46 = vadd.f32 %v1449_v58, %v1327_v6  ;;  %v2389_v58 = vld [vmem:[#allocation2 + $0x19a] sm:$0xff] }
 0x265   : > { %v1256_v51 = vpop.f32.mrf.mxu1  ;;  %v1643_v22 = vpop.f32.mrf.mxu3 }
 0x266   : > { %v2014_v36 = vmax.f32 %v1982_v13, 0.0  ;;  %v1717_v16 = vadd.f32 %v1643_v22, %v1523_v46  ;;  %1884 = vmatmul.f32.gmra.mxu0 %v2386_v40  ;;  %v1328_v18 = vadd.f32 %v1256_v51, %v2953_v3  ;;  %v2326_v51 = vld [vmem:[#allocation2 + $0x1a0] sm:$0xff] }
 0x268   : > { %2046 = vst [vmem:[%s2762_s11 + $0x50] sm:$0xff] %v2014_v36  ;;  %v1911_v34 = vadd.f32 %v1837_v63, %v1717_v16  ;;  %1303 = vmatmul.f32.gmra.mxu1 %v2385_v44  ;;  %1499 = vmatmul.f32.gmra.mxu2 %v2323_v14  ;;  %v2358_v36 = vld [vmem:[#allocation2 + $0x1a1] sm:$0xff] }
 0x26a   : > { %v1947_v55 = vmul.f32 %v3016_v21, %v1911_v34  ;;  %1693 = vmatmul.f32.gmra.mxu3 %v2355_v28 }
 0x26b   : > { %v1452_v50 = vpop.f32.mrf.mxu2  ;;  %v1840_v9 = vpop.f32.mrf.mxu0 }
 0x26c   : > { %v1983_v38 = vadd.f32 %v3021_v27, %v1947_v55  ;;  %v1524_v33 = vadd.f32 %v1452_v50, %v1328_v18  ;;  %v2390_v55 = vld [vmem:[#allocation2 + $0x1a2] sm:$0xff] }
 0x26d   : > { %v1259_v8 = vpop.f32.mrf.mxu1  ;;  %v1646_v49 = vpop.f32.mrf.mxu3 }
 0x26e   : > { %v2015_v43 = vmax.f32 %v1983_v38, 0.0  ;;  %v1718_v39 = vadd.f32 %v1646_v49, %v1524_v33  ;;  %1887 = vmatmul.f32.gmra.mxu0 %v2387_v10  ;;  %v1329_v3 = vadd.f32 %v1259_v8, %v2956_v0 }
 0x270   : > { %2047 = vst [vmem:[%s2762_s11 + $0x58] sm:$0xff] %v2015_v43  ;;  %v1912_v20 = vadd.f32 %v1840_v9, %v1718_v39  ;;  %1306 = vmatmul.f32.gmra.mxu1 %v2386_v40  ;;  %1502 = vmatmul.f32.gmra.mxu2 %v2324_v45 }
 0x272   : > { %v1948_v61 = vmul.f32 %v3016_v21, %v1912_v20  ;;  %1696 = vmatmul.f32.gmra.mxu3 %v2356_v52 }
 0x273   : > { %v1455_v15 = vpop.f32.mrf.mxu2  ;;  %v1843_v54 = vpop.f32.mrf.mxu0 }
 0x274   : > { %v1984_v44 = vadd.f32 %v3021_v27, %v1948_v61  ;;  %v1525_v2 = vadd.f32 %v1455_v15, %v1329_v3 }
 0x275   : > { %v1262_v35 = vpop.f32.mrf.mxu1  ;;  %v1649_v17 = vpop.f32.mrf.mxu3 }
 0x276   : > { %v2016_v56 = vmax.f32 %v1984_v44, 0.0  ;;  %v1719_v26 = vadd.f32 %v1649_v17, %v1525_v2  ;;  %1890 = vmatmul.f32.gmra.mxu0 %v2388_v29  ;;  %v1330_v0 = vadd.f32 %v1262_v35, %v2959_v37 }
 0x278   : > { %2048 = vst [vmem:[%s2762_s11 + $0x60] sm:$0xff] %v2016_v56  ;;  %v1913_v11 = vadd.f32 %v1843_v54, %v1719_v26  ;;  %1309 = vmatmul.f32.gmra.mxu1 %v2387_v10  ;;  %1505 = vmatmul.f32.gmra.mxu2 %v2325_v23 }
 0x27a   : > { %v1949_v47 = vmul.f32 %v3016_v21, %v1913_v11  ;;  %1699 = vmatmul.f32.gmra.mxu3 %v2357_v62 }
 0x27b   : > { %v1458_v6 = vpop.f32.mrf.mxu2  ;;  %v1846_v1 = vpop.f32.mrf.mxu0 }
 0x27c   : > { %v1985_v63 = vadd.f32 %v3021_v27, %v1949_v47  ;;  %v1526_v40 = vadd.f32 %v1458_v6, %v1330_v0 }
 0x27d   : > { %v1265_v13 = vpop.f32.mrf.mxu1  ;;  %v1652_v46 = vpop.f32.mrf.mxu3 }
 0x27e   : > { %v2017_v22 = vmax.f32 %v1985_v63, 0.0  ;;  %v1720_v14 = vadd.f32 %v1652_v46, %v1526_v40  ;;  %1893 = vmatmul.f32.gmra.mxu0 %v2389_v58  ;;  %v1331_v37 = vadd.f32 %v1265_v13, %v2962_v57 }
 0x280   : > { %2049 = vst [vmem:[%s2762_s11 + $0x68] sm:$0xff] %v2017_v22  ;;  %v1914_v16 = vadd.f32 %v1846_v1, %v1720_v14  ;;  %1312 = vmatmul.f32.gmra.mxu1 %v2388_v29  ;;  %1508 = vmatmul.f32.gmra.mxu2 %v2326_v51 }
 0x282   : > { %v1950_v28 = vmul.f32 %v3016_v21, %v1914_v16  ;;  %1702 = vmatmul.f32.gmra.mxu3 %v2358_v36 }
 0x283   : > { %v1461_v34 = vpop.f32.mrf.mxu2  ;;  %v1849_v18 = vpop.f32.mrf.mxu0 }
 0x284   : > { %v1986_v50 = vadd.f32 %v3021_v27, %v1950_v28  ;;  %v1527_v9 = vadd.f32 %v1461_v34, %v1331_v37 }
 0x285   : > { %v1268_v10 = vpop.f32.mrf.mxu1  ;;  %v1655_v38 = vpop.f32.mrf.mxu3 }
 0x286   : > { %v2018_v33 = vmax.f32 %v1986_v50, 0.0  ;;  %v1721_v8 = vadd.f32 %v1655_v38, %v1527_v9  ;;  %1896 = vmatmul.f32.gmra.mxu0 %v2390_v55  ;;  %v1332_v45 = vadd.f32 %v1268_v10, %v2965_v7 }
 0x288   : > { %2050 = vst [vmem:[%s2762_s11 + $0x70] sm:$0xff] %v2018_v33  ;;  %v1915_v49 = vadd.f32 %v1849_v18, %v1721_v8 }
 0x28a   : > { %v1951_v57 = vmul.f32 %v3016_v21, %v1915_v49 }
 0x28b   : > { %v1464_v43 = vpop.f32.mrf.mxu2  ;;  %v1852_v39 = vpop.f32.mrf.mxu0 }
 0x28c   : > { %v1987_v52 = vadd.f32 %v3021_v27, %v1951_v57  ;;  %v1528_v20 = vadd.f32 %v1464_v43, %v1332_v45 }
 0x28d   : > { %v1271_v3 = vpop.f32.mrf.mxu1  ;;  %v1658_v61 = vpop.f32.mrf.mxu3 }
 0x28e   : > { %v2019_v15 = vmax.f32 %v1987_v52, 0.0  ;;  %v1722_v54 = vadd.f32 %v1658_v61, %v1528_v20  ;;  %v1333_v44 = vadd.f32 %v1271_v3, %v2968_v31 }
 0x290   : > { %2051 = vst [vmem:[%s2762_s11 + $0x78] sm:$0xff] %v2019_v15  ;;  %v1916_v29 = vadd.f32 %v1852_v39, %v1722_v54 }
 0x292   : > { %v1952_v2 = vmul.f32 %v3016_v21, %v1916_v29 }
 0x293   : > { %v1467_v35 = vpop.f32.mrf.mxu2  ;;  %v1855_v7 = vpop.f32.mrf.mxu0 }
 0x294   : > { %v1988_v17 = vadd.f32 %v3021_v27, %v1952_v2  ;;  %v1529_v23 = vadd.f32 %v1467_v35, %v1333_v44 }
 0x295   : > { %v1274_v56 = vpop.f32.mrf.mxu1  ;;  %v1661_v26 = vpop.f32.mrf.mxu3 }
 0x296   : > { %v2020_v62 = vmax.f32 %v1988_v17, 0.0  ;;  %v1723_v11 = vadd.f32 %v1661_v26, %v1529_v23  ;;  %v1334_v47 = vadd.f32 %v1274_v56, %v2971_v53 }
 0x298   : > { %2052 = vst [vmem:[%s2762_s11 + $0x80] sm:$0xff] %v2020_v62  ;;  %v1917_v0 = vadd.f32 %v1855_v7, %v1723_v11 }
 0x29a   : > { %v1953_v6 = vmul.f32 %v3016_v21, %v1917_v0 }
 0x29b   : > { %v1470_v1 = vpop.f32.mrf.mxu2  ;;  %v1858_v31 = vpop.f32.mrf.mxu0 }
 0x29c   : > { %v1989_v58 = vadd.f32 %v3021_v27, %v1953_v6  ;;  %v1530_v63 = vadd.f32 %v1470_v1, %v1334_v47 }
 0x29d   : > { %v1277_v40 = vpop.f32.mrf.mxu1  ;;  %v1664_v13 = vpop.f32.mrf.mxu3 }
 0x29e   : > { %v2021_v46 = vmax.f32 %v1989_v58, 0.0  ;;  %v1724_v51 = vadd.f32 %v1664_v13, %v1530_v63  ;;  %v1335_v14 = vadd.f32 %v1277_v40, %v2974_v12 }
 0x2a0   : > { %2053 = vst [vmem:[%s2762_s11 + $0x88] sm:$0xff] %v2021_v46  ;;  %v1918_v22 = vadd.f32 %v1858_v31, %v1724_v51 }
 0x2a2   : > { %v1954_v36 = vmul.f32 %v3016_v21, %v1918_v22 }
 0x2a3   : > { %v1473_v16 = vpop.f32.mrf.mxu2  ;;  %v1861_v53 = vpop.f32.mrf.mxu0 }
 0x2a4   : > { %v1990_v37 = vadd.f32 %v3021_v27, %v1954_v36  ;;  %v1531_v28 = vadd.f32 %v1473_v16, %v1335_v14 }
 0x2a5   : > { %v1280_v34 = vpop.f32.mrf.mxu1  ;;  %v1667_v18 = vpop.f32.mrf.mxu3 }
 0x2a6   : > { %v2022_v55 = vmax.f32 %v1990_v37, 0.0  ;;  %v1725_v50 = vadd.f32 %v1667_v18, %v1531_v28  ;;  %v1336_v10 = vadd.f32 %v1280_v34, %v2977_v42 }
 0x2a8   : > { %2054 = vst [vmem:[%s2762_s11 + $0x90] sm:$0xff] %v2022_v55  ;;  %v1919_v9 = vadd.f32 %v1861_v53, %v1725_v50 }
 0x2aa   : > { %v1955_v38 = vmul.f32 %v3016_v21, %v1919_v9 }
 0x2ab   : > { %v1476_v33 = vpop.f32.mrf.mxu2  ;;  %v1864_v12 = vpop.f32.mrf.mxu0 }
 0x2ac   : > { %v1991_v8 = vadd.f32 %v3021_v27, %v1955_v38  ;;  %v1532_v49 = vadd.f32 %v1476_v33, %v1336_v10 }
 0x2ad   : > { %v1283_v45 = vpop.f32.mrf.mxu1  ;;  %v1670_v57 = vpop.f32.mrf.mxu3 }
 0x2ae   : > { %v2023_v43 = vmax.f32 %v1991_v8, 0.0  ;;  %v1726_v39 = vadd.f32 %v1670_v57, %v1532_v49  ;;  %v1337_v20 = vadd.f32 %v1283_v45, %v2980_v48 }
 0x2b0   : > { %2055 = vst [vmem:[%s2762_s11 + $0x98] sm:$0xff] %v2023_v43  ;;  %v1920_v52 = vadd.f32 %v1864_v12, %v1726_v39 }
 0x2b2   : > { %v1956_v3 = vmul.f32 %v3016_v21, %v1920_v52 }
 0x2b3   : > { %v1479_v61 = vpop.f32.mrf.mxu2  ;;  %v1867_v42 = vpop.f32.mrf.mxu0 }
 0x2b4   : > { %v1992_v15 = vadd.f32 %v3021_v27, %v1956_v3  ;;  %v1533_v54 = vadd.f32 %v1479_v61, %v1337_v20 }
 0x2b5   : > { %v1286_v29 = vpop.f32.mrf.mxu1  ;;  %v1673_v44 = vpop.f32.mrf.mxu3 }
 0x2b6   : > { %v2024_v2 = vmax.f32 %v1992_v15, 0.0  ;;  %v1727_v35 = vadd.f32 %v1673_v44, %v1533_v54  ;;  %v1338_v17 = vadd.f32 %v1286_v29, %v2983_v30 }
 0x2b8   : > { %2056 = vst [vmem:[%s2762_s11 + $0xa0] sm:$0xff] %v2024_v2  ;;  %v1921_v7 = vadd.f32 %v1867_v42, %v1727_v35 }
 0x2ba   : > { %v1957_v23 = vmul.f32 %v3016_v21, %v1921_v7 }
 0x2bb   : > { %v1482_v56 = vpop.f32.mrf.mxu2  ;;  %v1870_v48 = vpop.f32.mrf.mxu0 }
 0x2bc   : > { %v1993_v26 = vadd.f32 %v3021_v27, %v1957_v23  ;;  %v1534_v62 = vadd.f32 %v1482_v56, %v1338_v17 }
 0x2bd   : > { %v1289_v11 = vpop.f32.mrf.mxu1  ;;  %v1676_v0 = vpop.f32.mrf.mxu3 }
 0x2be   : > { %v2025_v47 = vmax.f32 %v1993_v26, 0.0  ;;  %v1728_v6 = vadd.f32 %v1676_v0, %v1534_v62  ;;  %v1339_v31 = vadd.f32 %v1289_v11, %v2986_v24 }
 0x2c0   : > { %2057 = vst [vmem:[%s2762_s11 + $0xa8] sm:$0xff] %v2025_v47  ;;  %v1922_v1 = vadd.f32 %v1870_v48, %v1728_v6 }
 0x2c2   : > { %v1958_v58 = vmul.f32 %v3016_v21, %v1922_v1 }
 0x2c3   : > { %v1485_v63 = vpop.f32.mrf.mxu2  ;;  %v1873_v30 = vpop.f32.mrf.mxu0 }
 0x2c4   : > { %v1994_v40 = vadd.f32 %v3021_v27, %v1958_v58  ;;  %v1535_v13 = vadd.f32 %v1485_v63, %v1339_v31 }
 0x2c5   : > { %v1292_v46 = vpop.f32.mrf.mxu1  ;;  %v1679_v51 = vpop.f32.mrf.mxu3 }
 0x2c6   : > { %v2026_v22 = vmax.f32 %v1994_v40, 0.0  ;;  %v1729_v14 = vadd.f32 %v1679_v51, %v1535_v13  ;;  %v1340_v16 = vadd.f32 %v1292_v46, %v2989_v41 }
 0x2c8   : > { %2058 = vst [vmem:[%s2762_s11 + $0xb0] sm:$0xff] %v2026_v22  ;;  %v1923_v36 = vadd.f32 %v1873_v30, %v1729_v14 }
 0x2ca   : > { %v1959_v53 = vmul.f32 %v3016_v21, %v1923_v36 }
 0x2cb   : > { %v1488_v37 = vpop.f32.mrf.mxu2  ;;  %v1876_v24 = vpop.f32.mrf.mxu0 }
 0x2cc   : > { %v1995_v28 = vadd.f32 %v3021_v27, %v1959_v53  ;;  %v1536_v34 = vadd.f32 %v1488_v37, %v1340_v16 }
 0x2cd   : > { %v1295_v18 = vpop.f32.mrf.mxu1  ;;  %v1682_v55 = vpop.f32.mrf.mxu3 }
 0x2ce   : > { %v2027_v50 = vmax.f32 %v1995_v28, 0.0  ;;  %v1730_v9 = vadd.f32 %v1682_v55, %v1536_v34  ;;  %v1341_v38 = vadd.f32 %v1295_v18, %v2992_v4 }
 0x2d0   : > { %2059 = vst [vmem:[%s2762_s11 + $0xb8] sm:$0xff] %v2027_v50  ;;  %v1924_v10 = vadd.f32 %v1876_v24, %v1730_v9 }
 0x2d2   : > { %v1960_v33 = vmul.f32 %v3016_v21, %v1924_v10 }
 0x2d3   : > { %v1491_v12 = vpop.f32.mrf.mxu2  ;;  %v1879_v41 = vpop.f32.mrf.mxu0 }
 0x2d4   : > { %v1996_v8 = vadd.f32 %v3021_v27, %v1960_v33  ;;  %v1537_v49 = vadd.f32 %v1491_v12, %v1341_v38 }
 0x2d5   : > { %v1298_v45 = vpop.f32.mrf.mxu1  ;;  %v1685_v57 = vpop.f32.mrf.mxu3 }
 0x2d6   : > { %v2028_v43 = vmax.f32 %v1996_v8, 0.0  ;;  %v1731_v39 = vadd.f32 %v1685_v57, %v1537_v49  ;;  %v1342_v20 = vadd.f32 %v1298_v45, %v2995_v32 }
 0x2d8   : > { %2060 = vst [vmem:[%s2762_s11 + $0xc0] sm:$0xff] %v2028_v43  ;;  %v1925_v52 = vadd.f32 %v1879_v41, %v1731_v39 }
 0x2da   : > { %v1961_v3 = vmul.f32 %v3016_v21, %v1925_v52 }
 0x2db   : > { %v1494_v61 = vpop.f32.mrf.mxu2  ;;  %v1882_v4 = vpop.f32.mrf.mxu0 }
 0x2dc   : > { %v1997_v42 = vadd.f32 %v3021_v27, %v1961_v3  ;;  %v1538_v15 = vadd.f32 %v1494_v61, %v1342_v20 }
 0x2dd   : > { %v1301_v54 = vpop.f32.mrf.mxu1  ;;  %v1688_v29 = vpop.f32.mrf.mxu3 }
 0x2de   : > { %v2029_v44 = vmax.f32 %v1997_v42, 0.0  ;;  %v1732_v2 = vadd.f32 %v1688_v29, %v1538_v15  ;;  %v1343_v7 = vadd.f32 %v1301_v54, %v2998_v59 }
 0x2e0   : > { %2061 = vst [vmem:[%s2762_s11 + $0xc8] sm:$0xff] %v2029_v44  ;;  %v1926_v35 = vadd.f32 %v1882_v4, %v1732_v2 }
 0x2e2   : > { %v1962_v17 = vmul.f32 %v3016_v21, %v1926_v35 }
 0x2e3   : > { %v1497_v23 = vpop.f32.mrf.mxu2  ;;  %v1885_v32 = vpop.f32.mrf.mxu0 }
 0x2e4   : > { %v1998_v56 = vadd.f32 %v3021_v27, %v1962_v17  ;;  %v1539_v48 = vadd.f32 %v1497_v23, %v1343_v7 }
 0x2e5   : > { %v1304_v26 = vpop.f32.mrf.mxu1  ;;  %v1691_v62 = vpop.f32.mrf.mxu3 }
 0x2e6   : > { %v2030_v11 = vmax.f32 %v1998_v56, 0.0  ;;  %v1733_v0 = vadd.f32 %v1691_v62, %v1539_v48  ;;  %v1344_v6 = vadd.f32 %v1304_v26, %v3001_v19 }
 0x2e8   : > { %2062 = vst [vmem:[%s2762_s11 + $0xd0] sm:$0xff] %v2030_v11  ;;  %v1927_v47 = vadd.f32 %v1885_v32, %v1733_v0 }
 0x2ea   : > { %v1963_v1 = vmul.f32 %v3016_v21, %v1927_v47 }
 0x2eb   : > { %v1500_v31 = vpop.f32.mrf.mxu2  ;;  %v1888_v59 = vpop.f32.mrf.mxu0 }
 0x2ec   : > { %v1999_v58 = vadd.f32 %v3021_v27, %v1963_v1  ;;  %v1540_v63 = vadd.f32 %v1500_v31, %v1344_v6 }
 0x2ed   : > { %v1307_v30 = vpop.f32.mrf.mxu1  ;;  %v1694_v40 = vpop.f32.mrf.mxu3 }
 0x2ee   : > { %v2031_v13 = vmax.f32 %v1999_v58, 0.0  ;;  %v1734_v46 = vadd.f32 %v1694_v40, %v1540_v63  ;;  %v1345_v22 = vadd.f32 %v1307_v30, %v3004_v25 }
 0x2f0   : > { %2063 = vst [vmem:[%s2762_s11 + $0xd8] sm:$0xff] %v2031_v13  ;;  %v1928_v51 = vadd.f32 %v1888_v59, %v1734_v46 }
 0x2f2   : > { %v1964_v14 = vmul.f32 %v3016_v21, %v1928_v51 }
 0x2f3   : > { %v1503_v36 = vpop.f32.mrf.mxu2  ;;  %v1891_v19 = vpop.f32.mrf.mxu0 }
 0x2f4   : > { %v2000_v16 = vadd.f32 %v3021_v27, %v1964_v14  ;;  %v1541_v53 = vadd.f32 %v1503_v36, %v1345_v22 }
 0x2f5   : > { %v1310_v37 = vpop.f32.mrf.mxu1  ;;  %v1697_v24 = vpop.f32.mrf.mxu3 }
 0x2f6   : > { %v2032_v28 = vmax.f32 %v2000_v16, 0.0  ;;  %v1735_v34 = vadd.f32 %v1697_v24, %v1541_v53  ;;  %v1346_v55 = vadd.f32 %v1310_v37, %v3007_v60 }
 0x2f8   : > { %2064 = vst [vmem:[%s2762_s11 + $0xe0] sm:$0xff] %v2032_v28  ;;  %v1929_v18 = vadd.f32 %v1891_v19, %v1735_v34 }
 0x2fa   : > { %v1965_v50 = vmul.f32 %v3016_v21, %v1929_v18 }
 0x2fb   : > { %v1506_v25 = vpop.f32.mrf.mxu2  ;;  %v1894_v9 = vpop.f32.mrf.mxu0 }
 0x2fc   : > { %v2001_v10 = vadd.f32 %v3021_v27, %v1965_v50  ;;  %v1542_v38 = vadd.f32 %v1506_v25, %v1346_v55 }
 0x2fd   : > { %v1700_v33 = vpop.f32.mrf.mxu3  ;;  %v1313_v8 = vpop.f32.mrf.mxu1 }
 0x2fe   : > { %v2033_v12 = vmax.f32 %v2001_v10, 0.0  ;;  %v1736_v41 = vadd.f32 %v1700_v33, %v1542_v38  ;;  %v1347_v45 = vadd.f32 %v1313_v8, %v3010_v5 }
 0x300   : > { %2065 = vst [vmem:[%s2762_s11 + $0xe8] sm:$0xff] %v2033_v12  ;;  %v1930_v49 = vadd.f32 %v1894_v9, %v1736_v41 }
 0x302   : > { %v1966_v60 = vmul.f32 %v3016_v21, %v1930_v49 }
 0x303   : > { %v1509_v57 = vpop.f32.mrf.mxu2  ;;  %v1897_v20 = vpop.f32.mrf.mxu0 }
 0x304   : > { %v2002_v43 = vadd.f32 %v3021_v27, %v1966_v60  ;;  %v1543_v39 = vadd.f32 %v1509_v57, %v1347_v45 }
 0x305   : > { %v1703_v52 = vpop.f32.mrf.mxu3 }
 0x306   : > { %v2034_v3 = vmax.f32 %v2002_v43, 0.0  ;;  %v1737_v61 = vadd.f32 %v1703_v52, %v1543_v39 }
 0x308   : > { %2066 = vst [vmem:[%s2762_s11 + $0xf0] sm:$0xff] %v2034_v3  ;;  %v1931_v5 = vadd.f32 %v1897_v20, %v1737_v61 }
 0x30a   : > { %v1967_v4 = vmul.f32 %v3016_v21, %v1931_v5 }
 0x30c   : > { %v2003_v42 = vadd.f32 %v3021_v27, %v1967_v4 }
 0x30e   : > { %v2035_v15 = vmax.f32 %v2003_v42, 0.0 }
 0x310   : > { %2067 = vst [vmem:[%s2762_s11 + $0xf8] sm:$0xff] %v2035_v15 }
 0x311   : > { %2601 = shalt.err (!%p2598_p13)
}
 0x312   : > { %s2664_s10 = smov 128   ;;  %s2665_s11 = smov 8  }
 0x313   : > { %2451 = dma.vmem_to_hbm [thread:$0]  (%p2731_p4), %s2085_s30, 4096, %s2087_s5, %s2069_s18, %s2664_s10, %s2664_s10, %s2665_s11  }
 0x314 PF: > { %p2463_p0 = scmp.ge.s32.totalorder %s2658_s20, 2  ;;  %s2101_s21 = sand.u32 1, %s2638_s15  }
 0x315   : > { %s2102_s22 = scalar_lea.sflag [#allocation6], %s2101_s21 }
 0x316   : > { %p2458_p1 = pnand %p2463_p0, %p2738_p8 }
 0x318   : > { %p2459_p2 = pneg %p2458_p1 }
 0x31a   : > { %2633 = dma.done.wait (%p2459_p2), %s2102_s22, 4096  }
 0x31b   : > { %2635 = vsyncadd (%p2459_p2), %s2102_s22, 4294963200  ;;  %s18_s20 = sadd.s32 1, %s2658_s20   ;;  %s3196_s15 = smov %s2642_s16 }
 0x31c   : > { %p15_p3 = scmp.ge.s32.totalorder %s18_s20, 4   ;;  %s3197_s16 = smov %s2646_s17 }
 0x31d   : > { %s3198_s17 = smov %s2744_s28  ;;  %s3199_s18 = smov %s2654_s19 }
 0x31e   : > { %s3200_s19 = smov %s3202_s23  ;;  %17 = sbr.rel (!%p15_p3) target bundleno = 5 (0x5), region = 102 }
 0x323   :  { %2108 = vsyncpa [#allocation5], 1 }
 0x324   :  { %2110 = vsyncpa [#allocation5 + $0x1], 1 }
 0x325   :  { %2111 = vsyncpa [#allocation6], 1 }
 0x326   :  { %2113 = vsyncpa [#allocation6 + $0x1], 1 }
 0x327   :  { %2114 = vsyncmov [#allocation3] }
 0x32a   :  { %s2115_s25 = vpop.sfrf %2114 }
 0x32b   :  { %p2396_p4 = scmp.ne.s32.totalorder %s2115_s25, 0 }
 0x32d   :  { %2119 = shalt.err (%p2396_p4)  }
 0x32e   :  { %2121 = vsyncmov [#allocation3 + $0x1] }
 0x331   :  { %s2122_s27 = vpop.sfrf %2121 }
 0x332   :  { %p2397_p8 = scmp.ne.s32.totalorder %s2122_s27, 0 }
 0x334   :  { %2126 = shalt.err (%p2397_p8)  }

</bundles_post_ra>
